<compile_context>
chip_gen: v7x
topology: tpu7x:2x2x1
jax: 0.10.0
libtpu: 0.0.40
codegen_flags: <defaults>
</compile_context>

<pallas_src>
import functools
import numpy as np

import jax
import jax.numpy as jnp
from jax import lax
from jax.experimental import pallas as pl
from jax.experimental.pallas import tpu as pltpu

# Exact 0/1-matrix gather through the MXU (see note above on HIGH vs HIGHEST).
_EXACT = lax.Precision.HIGHEST


def _round_up(x, m):
    return (x + m - 1) // m * m


# ----------------------- constant selection matrices (host) -----------------------
@functools.lru_cache(maxsize=None)
def _selection_matrices(K, S, Hp, Wp, OH, OW, OHp):
    """0/1 matrices for window extraction on a zero-padded (Hp, Wp) image.

    RH[kh*OHp + j, h] = 1  iff  j < OH and h == j*S + kh   (row / kh selection)
    RW[kw, w, i]      = 1  iff  w == i*S + kw              (col / kw selection)

    OHp = OH rounded up to a multiple of 8 so that per-kh candidate slices are
    aligned sublane views; the extra rows of RH are all-zero (harmless, trimmed
    by the wrapper).  Shared by every image and channel - no block-diagonal.
    """
    rh = np.zeros((K * OHp, Hp), np.float32)
    for kh in range(K):
        for j in range(OH):
            rh[kh * OHp + j, j * S + kh] = 1.0
    rw = np.zeros((K, Wp, OW), np.float32)
    for kw in range(K):
        for i in range(OW):
            rw[kw, i * S + kw, i] = 1.0
    return rh, rw


def _choose_images_per_step(N, Hp, Wp, OHp, OW):
    """Largest divisor of N fitting the per-step VMEM budget, grid kept >= 2."""
    per_img = 2 * 2 * 4 * (Hp * Wp + OHp * OW)   # u+v in & out, double-buffered, f32
    budget = 6 * 1024 * 1024                     # leaves headroom under 32 MiB scoped
    cap = max(1, budget // per_img)
    if N > 1:
        cap = min(cap, max(1, N // 2))           # >= 2 grid steps for v7x's 2 TCs
    best = 1
    for d in range(1, N + 1):
        if N % d == 0 and d <= cap:
            best = d
    return best


# ----------------------------- fused Pallas kernel ---------------------------------
@functools.lru_cache(maxsize=None)
def _build_pool_call(N, Nt, Hp, Wp, K, OHp, OW):
    KOHp = K * OHp

    def kernel(u_ref, v_ref, rh_ref, rw_ref, ou_ref, ov_ref):
        rh = rh_ref[...]                            # (K*OHp, Hp)   resident constant
        rw = [rw_ref[k] for k in range(K)]          # K x (Wp, OW)  hoisted loads

        def one_image(i):
            u = u_ref[i]                            # (Hp, Wp)
            v = v_ref[i]
            # Row (kh) selection: one MXU matmul per field (shared RH, no block-diag).
            ru = jnp.dot(rh, u, precision=_EXACT, preferred_element_type=jnp.float32)
            rv = jnp.dot(rh, v, precision=_EXACT, preferred_element_type=jnp.float32)
            # Column (kw) selection: K right matmuls per field.  Candidates for
            # every (kh, kw) now live at sublane offsets kh*OHp (multiples of 8),
            # so the max-scan below never slices along lanes.
            cu, cv, cm = [], [], []
            for kw in range(K):
                a = jnp.dot(ru, rw[kw], precision=_EXACT, preferred_element_type=jnp.float32)
                b = jnp.dot(rv, rw[kw], precision=_EXACT, preferred_element_type=jnp.float32)
                cu.append(a)
                cv.append(b)
                cm.append(a * a + b * b)            # squared magnitude (monotone in sqrt)
            # Running first-max over window offsets in torch's row-major order.
            best_u = best_v = best_m = None
            for kh in range(K):
                r0 = kh * OHp                       # aligned sublane offset -> cheap view
                for kw in range(K):
                    u_s = cu[kw][r0:r0 + OHp]
                    v_s = cv[kw][r0:r0 + OHp]
                    m_s = cm[kw][r0:r0 + OHp]
                    if best_m is None:
                        best_u, best_v, best_m = u_s, v_s, m_s
                    else:
                        take = m_s > best_m         # strict '>' keeps the first max
                        best_u = jnp.where(take, u_s, best_u)
                        best_v = jnp.where(take, v_s, best_v)
                        best_m = jnp.where(take, m_s, best_m)
            # One full-slab store per image (no per-channel partial stores).
            ou_ref[i] = best_u
            ov_ref[i] = best_v

        if Nt <= 8:
            for i in range(Nt):                     # short fixed trip count: unroll
                one_image(i)
        else:
            def body(i, carry):                     # large blocks: bound live ranges
                one_image(i)
                return carry
            lax.fori_loop(0, Nt, body, 0)

    out_sds = jax.ShapeDtypeStruct((N, OHp, OW), jnp.float32)
    return pl.pallas_call(
        kernel,
        out_shape=(out_sds, out_sds),
        grid=(N // Nt,),
        in_specs=[
            pl.BlockSpec((Nt, Hp, Wp), lambda g: (g, 0, 0)),
            pl.BlockSpec((Nt, Hp, Wp), lambda g: (g, 0, 0)),
            pl.BlockSpec((KOHp, Hp), lambda g: (0, 0)),        # resident constant
            pl.BlockSpec((K, Wp, OW), lambda g: (0, 0, 0)),    # resident constant
        ],
        out_specs=(
            pl.BlockSpec((Nt, OHp, OW), lambda g: (g, 0, 0)),
            pl.BlockSpec((Nt, OHp, OW), lambda g: (g, 0, 0)),
        ),
        compiler_params=pltpu.CompilerParams(
            dimension_semantics=("parallel",),
            vmem_limit_bytes=32 * 1024 * 1024,
        ),
    )


# ----------------------------- jitted forward wrapper ------------------------------
@functools.partial(jax.jit, static_argnames=("kernel_size", "stride", "padding"))
def vector_max_pool(u, v, *, kernel_size, stride, padding):
    B, C, H, W = u.shape
    K, S, P = kernel_size, stride, padding
    OH = (H + 2 * P - K) // S + 1
    OW = (W + 2 * P - K) // S + 1
    OHp = _round_up(OH, 8)
    Hp, Wp = H + 2 * P, W + 2 * P
    N = B * C

    rh, rw = _selection_matrices(K, S, Hp, Wp, OH, OW, OHp)    # trace-time constants
    Nt = _choose_images_per_step(N, Hp, Wp, OHp, OW)
    call = _build_pool_call(N, Nt, Hp, Wp, K, OHp, OW)

    pad = ((0, 0), (0, 0), (P, P), (P, P))
    u2 = jnp.pad(u.astype(jnp.float32), pad).reshape(N, Hp, Wp)
    v2 = jnp.pad(v.astype(jnp.float32), pad).reshape(N, Hp, Wp)
    ou, ov = call(u2, v2, jnp.asarray(rh), jnp.asarray(rw))
    ou = ou[:, :OH, :].reshape(B, C, OH, OW).astype(u.dtype)
    ov = ov[:, :OH, :].reshape(B, C, OH, OW).astype(v.dtype)
    return ou, ov


class VectorMaxPool:
    """Pallas/JAX equivalent of the PyTorch VectorMaxPool module."""

    def __init__(self, kernel_size, stride=None, padding=0):
        self.kernel_size = kernel_size
        self.stride = stride or kernel_size
        self.padding = padding

    def __call__(self, u, v):
        return vector_max_pool(u, v, kernel_size=self.kernel_size,
                               stride=self.stride, padding=self.padding)


# ----------------------------- numpy reference -------------------------------------
def vector_max_pool_reference(u, v, K, S, P):
    u = np.asarray(u, np.float32)
    v = np.asarray(v, np.float32)
    B, C, H, W = u.shape
    OH = (H + 2 * P - K) // S + 1
    OW = (W + 2 * P - K) // S + 1
    mp = np.full((B, C, H + 2 * P, W + 2 * P), -np.inf, np.float32)
    up = np.zeros((B, C, H + 2 * P, W + 2 * P), np.float32)
    vp = np.zeros_like(up)
    mp[:, :, P:P + H, P:P + W] = np.sqrt(u * u + v * v)
    up[:, :, P:P + H, P:P + W] = u
    vp[:, :, P:P + H, P:P + W] = v
    ou = np.zeros((B, C, OH, OW), np.float32)
    ov = np.zeros_like(ou)
    for j in range(OH):
        for i in range(OW):
            wm = mp[:, :, j * S:j * S + K, i * S:i * S + K].reshape(B, C, -1)
            wu = up[:, :, j * S:j * S + K, i * S:i * S + K].reshape(B, C, -1)
            wv = vp[:, :, j * S:j * S + K, i * S:i * S + K].reshape(B, C, -1)
            idx = wm.argmax(-1)[..., None]          # first max, row-major (torch order)
            ou[:, :, j, i] = np.take_along_axis(wu, idx, -1)[..., 0]
            ov[:, :, j, i] = np.take_along_axis(wv, idx, -1)[..., 0]
    return ou, ov


# ----------------------------- main -------------------------------------------------
if __name__ == "__main__":
    key = jax.random.PRNGKey(0)
    ku, kv = jax.random.split(key)

    B, C, H, W = 2, 4, 16, 16
    u = jax.random.normal(ku, (B, C, H, W), jnp.float32)
    v = jax.random.normal(kv, (B, C, H, W), jnp.float32)

    # default config: stride defaults to kernel_size (non-overlapping 2x2 pool)
    pool = VectorMaxPool(kernel_size=2)
    ou, ov = pool(u, v)
    jax.block_until_ready((ou, ov))
    ru, rv = vector_max_pool_reference(u, v, 2, 2, 0)
    np.testing.assert_allclose(np.asarray(ou), ru, rtol=1e-5, atol=1e-5)
    np.testing.assert_allclose(np.asarray(ov), rv, rtol=1e-5, atol=1e-5)

    # overlapping windows + zero padding
    pool2 = VectorMaxPool(kernel_size=3, stride=2, padding=1)
    ou2, ov2 = pool2(u, v)
    jax.block_until_ready((ou2, ov2))
    ru2, rv2 = vector_max_pool_reference(u, v, 3, 2, 1)
    np.testing.assert_allclose(np.asarray(ou2), ru2, rtol=1e-5, atol=1e-5)
    np.testing.assert_allclose(np.asarray(ov2), rv2, rtol=1e-5, atol=1e-5)

    print("KERNEL_OK")
</pallas_src>

<mosaic_0001>
module attributes {stable_mosaic.version = 11 : i64} {
  func.func @kernel(%arg0: i32, %arg1: memref<4x16x16xf32, #tpu.memory_space<vmem>>, %arg2: memref<4x16x16xf32, #tpu.memory_space<vmem>>, %arg3: memref<16x16xf32, #tpu.memory_space<vmem>>, %arg4: memref<2x16x8xf32, #tpu.memory_space<vmem>>, %arg5: memref<4x8x8xf32, #tpu.memory_space<vmem>>, %arg6: memref<4x8x8xf32, #tpu.memory_space<vmem>>) attributes {dimension_semantics = [#tpu.dimension_semantics<parallel>], iteration_bounds = array<i64: 2>, scalar_prefetch = 0 : i64, scratch_operands = 0 : i64, tpu.core_type = #tpu.core_type<tc>, window_params = [{transform_indices = @transform_0, window_bounds = array<i64: 4, 16, 16>}, {transform_indices = @transform_1, window_bounds = array<i64: 4, 16, 16>}, {pipeline_mode = #tpu.pipeline_mode<synchronous>, transform_indices = @transform_2, window_bounds = array<i64: 16, 16>}, {pipeline_mode = #tpu.pipeline_mode<synchronous>, transform_indices = @transform_3, window_bounds = array<i64: 2, 16, 8>}, {transform_indices = @transform_4, window_bounds = array<i64: 4, 8, 8>}, {transform_indices = @transform_5, window_bounds = array<i64: 4, 8, 8>}]} {
    %c0 = arith.constant 0 : index
    %c0_0 = arith.constant 0 : index
    %0 = vector.load %arg3[%c0, %c0_0] : memref<16x16xf32, #tpu.memory_space<vmem>>, vector<16x16xf32>
    %c0_1 = arith.constant 0 : index
    %c0_2 = arith.constant 0 : index
    %c0_3 = arith.constant 0 : index
    %1 = vector.load %arg4[%c0_1, %c0_2, %c0_3] : memref<2x16x8xf32, #tpu.memory_space<vmem>>, vector<1x16x8xf32>
    %2 = vector.shape_cast %1 : vector<1x16x8xf32> to vector<16x8xf32>
    %c1 = arith.constant 1 : index
    %c0_4 = arith.constant 0 : index
    %c0_5 = arith.constant 0 : index
    %3 = vector.load %arg4[%c1, %c0_4, %c0_5] : memref<2x16x8xf32, #tpu.memory_space<vmem>>, vector<1x16x8xf32>
    %4 = vector.shape_cast %3 : vector<1x16x8xf32> to vector<16x8xf32>
    %c0_6 = arith.constant 0 : index
    %c0_7 = arith.constant 0 : index
    %c0_8 = arith.constant 0 : index
    %5 = vector.load %arg1[%c0_6, %c0_7, %c0_8] : memref<4x16x16xf32, #tpu.memory_space<vmem>>, vector<1x16x16xf32>
    %6 = vector.shape_cast %5 : vector<1x16x16xf32> to vector<16x16xf32>
    %c0_9 = arith.constant 0 : index
    %c0_10 = arith.constant 0 : index
    %c0_11 = arith.constant 0 : index
    %7 = vector.load %arg2[%c0_9, %c0_10, %c0_11] : memref<4x16x16xf32, #tpu.memory_space<vmem>>, vector<1x16x16xf32>
    %8 = vector.shape_cast %7 : vector<1x16x16xf32> to vector<16x16xf32>
    %cst = arith.constant dense<0.000000e+00> : vector<16x16xf32>
    %9 = tpu.matmul %0, %6, %cst {dimension_numbers = #tpu.dot_dimension_numbers<[1], [0], [0], [1], [0, 0, 1, 1], [], []>, precision = #tpu.contract_precision<fp32>} : vector<16x16xf32>, vector<16x16xf32>, vector<16x16xf32> -> vector<16x16xf32>
    %cst_12 = arith.constant dense<0.000000e+00> : vector<16x16xf32>
    %10 = tpu.matmul %0, %8, %cst_12 {dimension_numbers = #tpu.dot_dimension_numbers<[1], [0], [0], [1], [0, 0, 1, 1], [], []>, precision = #tpu.contract_precision<fp32>} : vector<16x16xf32>, vector<16x16xf32>, vector<16x16xf32> -> vector<16x16xf32>
    %cst_13 = arith.constant dense<0.000000e+00> : vector<16x8xf32>
    %11 = tpu.matmul %9, %2, %cst_13 {dimension_numbers = #tpu.dot_dimension_numbers<[1], [0], [0], [1], [0, 0, 1, 1], [], []>, precision = #tpu.contract_precision<fp32>} : vector<16x16xf32>, vector<16x8xf32>, vector<16x8xf32> -> vector<16x8xf32>
    %cst_14 = arith.constant dense<0.000000e+00> : vector<16x8xf32>
    %12 = tpu.matmul %10, %2, %cst_14 {dimension_numbers = #tpu.dot_dimension_numbers<[1], [0], [0], [1], [0, 0, 1, 1], [], []>, precision = #tpu.contract_precision<fp32>} : vector<16x16xf32>, vector<16x8xf32>, vector<16x8xf32> -> vector<16x8xf32>
    %13 = arith.mulf %11, %11 : vector<16x8xf32>
    %14 = arith.mulf %12, %12 : vector<16x8xf32>
    %15 = arith.addf %13, %14 : vector<16x8xf32>
    %cst_15 = arith.constant dense<0.000000e+00> : vector<16x8xf32>
    %16 = tpu.matmul %9, %4, %cst_15 {dimension_numbers = #tpu.dot_dimension_numbers<[1], [0], [0], [1], [0, 0, 1, 1], [], []>, precision = #tpu.contract_precision<fp32>} : vector<16x16xf32>, vector<16x8xf32>, vector<16x8xf32> -> vector<16x8xf32>
    %cst_16 = arith.constant dense<0.000000e+00> : vector<16x8xf32>
    %17 = tpu.matmul %10, %4, %cst_16 {dimension_numbers = #tpu.dot_dimension_numbers<[1], [0], [0], [1], [0, 0, 1, 1], [], []>, precision = #tpu.contract_precision<fp32>} : vector<16x16xf32>, vector<16x8xf32>, vector<16x8xf32> -> vector<16x8xf32>
    %18 = arith.mulf %16, %16 : vector<16x8xf32>
    %19 = arith.mulf %17, %17 : vector<16x8xf32>
    %20 = arith.addf %18, %19 : vector<16x8xf32>
    %21 = vector.extract_strided_slice %11 {offsets = [0, 0], sizes = [8, 8], strides = [1, 1]} : vector<16x8xf32> to vector<8x8xf32>
    %22 = vector.extract_strided_slice %12 {offsets = [0, 0], sizes = [8, 8], strides = [1, 1]} : vector<16x8xf32> to vector<8x8xf32>
    %23 = vector.extract_strided_slice %15 {offsets = [0, 0], sizes = [8, 8], strides = [1, 1]} : vector<16x8xf32> to vector<8x8xf32>
    %24 = vector.extract_strided_slice %16 {offsets = [0, 0], sizes = [8, 8], strides = [1, 1]} : vector<16x8xf32> to vector<8x8xf32>
    %25 = vector.extract_strided_slice %17 {offsets = [0, 0], sizes = [8, 8], strides = [1, 1]} : vector<16x8xf32> to vector<8x8xf32>
    %26 = vector.extract_strided_slice %20 {offsets = [0, 0], sizes = [8, 8], strides = [1, 1]} : vector<16x8xf32> to vector<8x8xf32>
    %27 = arith.cmpf ogt, %26, %23 : vector<8x8xf32>
    %28 = arith.select %27, %24, %21 : vector<8x8xi1>, vector<8x8xf32>
    %29 = arith.select %27, %25, %22 : vector<8x8xi1>, vector<8x8xf32>
    %30 = arith.select %27, %26, %23 : vector<8x8xi1>, vector<8x8xf32>
    %31 = vector.extract_strided_slice %11 {offsets = [8, 0], sizes = [8, 8], strides = [1, 1]} : vector<16x8xf32> to vector<8x8xf32>
    %32 = vector.extract_strided_slice %12 {offsets = [8, 0], sizes = [8, 8], strides = [1, 1]} : vector<16x8xf32> to vector<8x8xf32>
    %33 = vector.extract_strided_slice %15 {offsets = [8, 0], sizes = [8, 8], strides = [1, 1]} : vector<16x8xf32> to vector<8x8xf32>
    %34 = arith.cmpf ogt, %33, %30 : vector<8x8xf32>
    %35 = arith.select %34, %31, %28 : vector<8x8xi1>, vector<8x8xf32>
    %36 = arith.select %34, %32, %29 : vector<8x8xi1>, vector<8x8xf32>
    %37 = arith.select %34, %33, %30 : vector<8x8xi1>, vector<8x8xf32>
    %38 = vector.extract_strided_slice %16 {offsets = [8, 0], sizes = [8, 8], strides = [1, 1]} : vector<16x8xf32> to vector<8x8xf32>
    %39 = vector.extract_strided_slice %17 {offsets = [8, 0], sizes = [8, 8], strides = [1, 1]} : vector<16x8xf32> to vector<8x8xf32>
    %40 = vector.extract_strided_slice %20 {offsets = [8, 0], sizes = [8, 8], strides = [1, 1]} : vector<16x8xf32> to vector<8x8xf32>
    %41 = arith.cmpf ogt, %40, %37 : vector<8x8xf32>
    %42 = arith.select %41, %38, %35 : vector<8x8xi1>, vector<8x8xf32>
    %43 = arith.select %41, %39, %36 : vector<8x8xi1>, vector<8x8xf32>
    %c0_17 = arith.constant 0 : index
    %c0_18 = arith.constant 0 : index
    %c0_19 = arith.constant 0 : index
    %44 = vector.load %arg5[%c0_17, %c0_18, %c0_19] : memref<4x8x8xf32, #tpu.memory_space<vmem>>, vector<1x8x8xf32>
    %45 = vector.shape_cast %44 : vector<1x8x8xf32> to vector<8x8xf32>
    %46 = vector.shape_cast %42 : vector<8x8xf32> to vector<1x8x8xf32>
    tpu.vector_store %arg5[%c0_17, %c0_18, %c0_19], %46 {strides = array<i32>} : memref<4x8x8xf32, #tpu.memory_space<vmem>>, vector<1x8x8xf32>,
    %c0_20 = arith.constant 0 : index
    %c0_21 = arith.constant 0 : index
    %c0_22 = arith.constant 0 : index
    %47 = vector.load %arg6[%c0_20, %c0_21, %c0_22] : memref<4x8x8xf32, #tpu.memory_space<vmem>>, vector<1x8x8xf32>
    %48 = vector.shape_cast %47 : vector<1x8x8xf32> to vector<8x8xf32>
    %49 = vector.shape_cast %43 : vector<8x8xf32> to vector<1x8x8xf32>
    tpu.vector_store %arg6[%c0_20, %c0_21, %c0_22], %49 {strides = array<i32>} : memref<4x8x8xf32, #tpu.memory_space<vmem>>, vector<1x8x8xf32>,
    %c1_23 = arith.constant 1 : index
    %c0_24 = arith.constant 0 : index
    %c0_25 = arith.constant 0 : index
    %50 = vector.load %arg1[%c1_23, %c0_24, %c0_25] : memref<4x16x16xf32, #tpu.memory_space<vmem>>, vector<1x16x16xf32>
    %51 = vector.shape_cast %50 : vector<1x16x16xf32> to vector<16x16xf32>
    %c1_26 = arith.constant 1 : index
    %c0_27 = arith.constant 0 : index
    %c0_28 = arith.constant 0 : index
    %52 = vector.load %arg2[%c1_26, %c0_27, %c0_28] : memref<4x16x16xf32, #tpu.memory_space<vmem>>, vector<1x16x16xf32>
    %53 = vector.shape_cast %52 : vector<1x16x16xf32> to vector<16x16xf32>
    %cst_29 = arith.constant dense<0.000000e+00> : vector<16x16xf32>
    %54 = tpu.matmul %0, %51, %cst_29 {dimension_numbers = #tpu.dot_dimension_numbers<[1], [0], [0], [1], [0, 0, 1, 1], [], []>, precision = #tpu.contract_precision<fp32>} : vector<16x16xf32>, vector<16x16xf32>, vector<16x16xf32> -> vector<16x16xf32>
    %cst_30 = arith.constant dense<0.000000e+00> : vector<16x16xf32>
    %55 = tpu.matmul %0, %53, %cst_30 {dimension_numbers = #tpu.dot_dimension_numbers<[1], [0], [0], [1], [0, 0, 1, 1], [], []>, precision = #tpu.contract_precision<fp32>} : vector<16x16xf32>, vector<16x16xf32>, vector<16x16xf32> -> vector<16x16xf32>
    %cst_31 = arith.constant dense<0.000000e+00> : vector<16x8xf32>
    %56 = tpu.matmul %54, %2, %cst_31 {dimension_numbers = #tpu.dot_dimension_numbers<[1], [0], [0], [1], [0, 0, 1, 1], [], []>, precision = #tpu.contract_precision<fp32>} : vector<16x16xf32>, vector<16x8xf32>, vector<16x8xf32> -> vector<16x8xf32>
    %cst_32 = arith.constant dense<0.000000e+00> : vector<16x8xf32>
    %57 = tpu.matmul %55, %2, %cst_32 {dimension_numbers = #tpu.dot_dimension_numbers<[1], [0], [0], [1], [0, 0, 1, 1], [], []>, precision = #tpu.contract_precision<fp32>} : vector<16x16xf32>, vector<16x8xf32>, vector<16x8xf32> -> vector<16x8xf32>
    %58 = arith.mulf %56, %56 : vector<16x8xf32>
    %59 = arith.mulf %57, %57 : vector<16x8xf32>
    %60 = arith.addf %58, %59 : vector<16x8xf32>
    %cst_33 = arith.constant dense<0.000000e+00> : vector<16x8xf32>
    %61 = tpu.matmul %54, %4, %cst_33 {dimension_numbers = #tpu.dot_dimension_numbers<[1], [0], [0], [1], [0, 0, 1, 1], [], []>, precision = #tpu.contract_precision<fp32>} : vector<16x16xf32>, vector<16x8xf32>, vector<16x8xf32> -> vector<16x8xf32>
    %cst_34 = arith.constant dense<0.000000e+00> : vector<16x8xf32>
    %62 = tpu.matmul %55, %4, %cst_34 {dimension_numbers = #tpu.dot_dimension_numbers<[1], [0], [0], [1], [0, 0, 1, 1], [], []>, precision = #tpu.contract_precision<fp32>} : vector<16x16xf32>, vector<16x8xf32>, vector<16x8xf32> -> vector<16x8xf32>
    %63 = arith.mulf %61, %61 : vector<16x8xf32>
    %64 = arith.mulf %62, %62 : vector<16x8xf32>
    %65 = arith.addf %63, %64 : vector<16x8xf32>
    %66 = vector.extract_strided_slice %56 {offsets = [0, 0], sizes = [8, 8], strides = [1, 1]} : vector<16x8xf32> to vector<8x8xf32>
    %67 = vector.extract_strided_slice %57 {offsets = [0, 0], sizes = [8, 8], strides = [1, 1]} : vector<16x8xf32> to vector<8x8xf32>
    %68 = vector.extract_strided_slice %60 {offsets = [0, 0], sizes = [8, 8], strides = [1, 1]} : vector<16x8xf32> to vector<8x8xf32>
    %69 = vector.extract_strided_slice %61 {offsets = [0, 0], sizes = [8, 8], strides = [1, 1]} : vector<16x8xf32> to vector<8x8xf32>
    %70 = vector.extract_strided_slice %62 {offsets = [0, 0], sizes = [8, 8], strides = [1, 1]} : vector<16x8xf32> to vector<8x8xf32>
    %71 = vector.extract_strided_slice %65 {offsets = [0, 0], sizes = [8, 8], strides = [1, 1]} : vector<16x8xf32> to vector<8x8xf32>
    %72 = arith.cmpf ogt, %71, %68 : vector<8x8xf32>
    %73 = arith.select %72, %69, %66 : vector<8x8xi1>, vector<8x8xf32>
    %74 = arith.select %72, %70, %67 : vector<8x8xi1>, vector<8x8xf32>
    %75 = arith.select %72, %71, %68 : vector<8x8xi1>, vector<8x8xf32>
    %76 = vector.extract_strided_slice %56 {offsets = [8, 0], sizes = [8, 8], strides = [1, 1]} : vector<16x8xf32> to vector<8x8xf32>
    %77 = vector.extract_strided_slice %57 {offsets = [8, 0], sizes = [8, 8], strides = [1, 1]} : vector<16x8xf32> to vector<8x8xf32>
    %78 = vector.extract_strided_slice %60 {offsets = [8, 0], sizes = [8, 8], strides = [1, 1]} : vector<16x8xf32> to vector<8x8xf32>
    %79 = arith.cmpf ogt, %78, %75 : vector<8x8xf32>
    %80 = arith.select %79, %76, %73 : vector<8x8xi1>, vector<8x8xf32>
    %81 = arith.select %79, %77, %74 : vector<8x8xi1>, vector<8x8xf32>
    %82 = arith.select %79, %78, %75 : vector<8x8xi1>, vector<8x8xf32>
    %83 = vector.extract_strided_slice %61 {offsets = [8, 0], sizes = [8, 8], strides = [1, 1]} : vector<16x8xf32> to vector<8x8xf32>
    %84 = vector.extract_strided_slice %62 {offsets = [8, 0], sizes = [8, 8], strides = [1, 1]} : vector<16x8xf32> to vector<8x8xf32>
    %85 = vector.extract_strided_slice %65 {offsets = [8, 0], sizes = [8, 8], strides = [1, 1]} : vector<16x8xf32> to vector<8x8xf32>
    %86 = arith.cmpf ogt, %85, %82 : vector<8x8xf32>
    %87 = arith.select %86, %83, %80 : vector<8x8xi1>, vector<8x8xf32>
    %88 = arith.select %86, %84, %81 : vector<8x8xi1>, vector<8x8xf32>
    %c1_35 = arith.constant 1 : index
    %c0_36 = arith.constant 0 : index
    %c0_37 = arith.constant 0 : index
    %89 = vector.load %arg5[%c1_35, %c0_36, %c0_37] : memref<4x8x8xf32, #tpu.memory_space<vmem>>, vector<1x8x8xf32>
    %90 = vector.shape_cast %89 : vector<1x8x8xf32> to vector<8x8xf32>
    %91 = vector.shape_cast %87 : vector<8x8xf32> to vector<1x8x8xf32>
    tpu.vector_store %arg5[%c1_35, %c0_36, %c0_37], %91 {strides = array<i32>} : memref<4x8x8xf32, #tpu.memory_space<vmem>>, vector<1x8x8xf32>,
    %c1_38 = arith.constant 1 : index
    %c0_39 = arith.constant 0 : index
    %c0_40 = arith.constant 0 : index
    %92 = vector.load %arg6[%c1_38, %c0_39, %c0_40] : memref<4x8x8xf32, #tpu.memory_space<vmem>>, vector<1x8x8xf32>
    %93 = vector.shape_cast %92 : vector<1x8x8xf32> to vector<8x8xf32>
    %94 = vector.shape_cast %88 : vector<8x8xf32> to vector<1x8x8xf32>
    tpu.vector_store %arg6[%c1_38, %c0_39, %c0_40], %94 {strides = array<i32>} : memref<4x8x8xf32, #tpu.memory_space<vmem>>, vector<1x8x8xf32>,
    %c2 = arith.constant 2 : index
    %c0_41 = arith.constant 0 : index
    %c0_42 = arith.constant 0 : index
    %95 = vector.load %arg1[%c2, %c0_41, %c0_42] : memref<4x16x16xf32, #tpu.memory_space<vmem>>, vector<1x16x16xf32>
    %96 = vector.shape_cast %95 : vector<1x16x16xf32> to vector<16x16xf32>
    %c2_43 = arith.constant 2 : index
    %c0_44 = arith.constant 0 : index
    %c0_45 = arith.constant 0 : index
    %97 = vector.load %arg2[%c2_43, %c0_44, %c0_45] : memref<4x16x16xf32, #tpu.memory_space<vmem>>, vector<1x16x16xf32>
    %98 = vector.shape_cast %97 : vector<1x16x16xf32> to vector<16x16xf32>
    %cst_46 = arith.constant dense<0.000000e+00> : vector<16x16xf32>
    %99 = tpu.matmul %0, %96, %cst_46 {dimension_numbers = #tpu.dot_dimension_numbers<[1], [0], [0], [1], [0, 0, 1, 1], [], []>, precision = #tpu.contract_precision<fp32>} : vector<16x16xf32>, vector<16x16xf32>, vector<16x16xf32> -> vector<16x16xf32>
    %cst_47 = arith.constant dense<0.000000e+00> : vector<16x16xf32>
    %100 = tpu.matmul %0, %98, %cst_47 {dimension_numbers = #tpu.dot_dimension_numbers<[1], [0], [0], [1], [0, 0, 1, 1], [], []>, precision = #tpu.contract_precision<fp32>} : vector<16x16xf32>, vector<16x16xf32>, vector<16x16xf32> -> vector<16x16xf32>
    %cst_48 = arith.constant dense<0.000000e+00> : vector<16x8xf32>
    %101 = tpu.matmul %99, %2, %cst_48 {dimension_numbers = #tpu.dot_dimension_numbers<[1], [0], [0], [1], [0, 0, 1, 1], [], []>, precision = #tpu.contract_precision<fp32>} : vector<16x16xf32>, vector<16x8xf32>, vector<16x8xf32> -> vector<16x8xf32>
    %cst_49 = arith.constant dense<0.000000e+00> : vector<16x8xf32>
    %102 = tpu.matmul %100, %2, %cst_49 {dimension_numbers = #tpu.dot_dimension_numbers<[1], [0], [0], [1], [0, 0, 1, 1], [], []>, precision = #tpu.contract_precision<fp32>} : vector<16x16xf32>, vector<16x8xf32>, vector<16x8xf32> -> vector<16x8xf32>
    %103 = arith.mulf %101, %101 : vector<16x8xf32>
    %104 = arith.mulf %102, %102 : vector<16x8xf32>
    %105 = arith.addf %103, %104 : vector<16x8xf32>
    %cst_50 = arith.constant dense<0.000000e+00> : vector<16x8xf32>
    %106 = tpu.matmul %99, %4, %cst_50 {dimension_numbers = #tpu.dot_dimension_numbers<[1], [0], [0], [1], [0, 0, 1, 1], [], []>, precision = #tpu.contract_precision<fp32>} : vector<16x16xf32>, vector<16x8xf32>, vector<16x8xf32> -> vector<16x8xf32>
    %cst_51 = arith.constant dense<0.000000e+00> : vector<16x8xf32>
    %107 = tpu.matmul %100, %4, %cst_51 {dimension_numbers = #tpu.dot_dimension_numbers<[1], [0], [0], [1], [0, 0, 1, 1], [], []>, precision = #tpu.contract_precision<fp32>} : vector<16x16xf32>, vector<16x8xf32>, vector<16x8xf32> -> vector<16x8xf32>
    %108 = arith.mulf %106, %106 : vector<16x8xf32>
    %109 = arith.mulf %107, %107 : vector<16x8xf32>
    %110 = arith.addf %108, %109 : vector<16x8xf32>
    %111 = vector.extract_strided_slice %101 {offsets = [0, 0], sizes = [8, 8], strides = [1, 1]} : vector<16x8xf32> to vector<8x8xf32>
    %112 = vector.extract_strided_slice %102 {offsets = [0, 0], sizes = [8, 8], strides = [1, 1]} : vector<16x8xf32> to vector<8x8xf32>
    %113 = vector.extract_strided_slice %105 {offsets = [0, 0], sizes = [8, 8], strides = [1, 1]} : vector<16x8xf32> to vector<8x8xf32>
    %114 = vector.extract_strided_slice %106 {offsets = [0, 0], sizes = [8, 8], strides = [1, 1]} : vector<16x8xf32> to vector<8x8xf32>
    %115 = vector.extract_strided_slice %107 {offsets = [0, 0], sizes = [8, 8], strides = [1, 1]} : vector<16x8xf32> to vector<8x8xf32>
    %116 = vector.extract_strided_slice %110 {offsets = [0, 0], sizes = [8, 8], strides = [1, 1]} : vector<16x8xf32> to vector<8x8xf32>
    %117 = arith.cmpf ogt, %116, %113 : vector<8x8xf32>
    %118 = arith.select %117, %114, %111 : vector<8x8xi1>, vector<8x8xf32>
    %119 = arith.select %117, %115, %112 : vector<8x8xi1>, vector<8x8xf32>
    %120 = arith.select %117, %116, %113 : vector<8x8xi1>, vector<8x8xf32>
    %121 = vector.extract_strided_slice %101 {offsets = [8, 0], sizes = [8, 8], strides = [1, 1]} : vector<16x8xf32> to vector<8x8xf32>
    %122 = vector.extract_strided_slice %102 {offsets = [8, 0], sizes = [8, 8], strides = [1, 1]} : vector<16x8xf32> to vector<8x8xf32>
    %123 = vector.extract_strided_slice %105 {offsets = [8, 0], sizes = [8, 8], strides = [1, 1]} : vector<16x8xf32> to vector<8x8xf32>
    %124 = arith.cmpf ogt, %123, %120 : vector<8x8xf32>
    %125 = arith.select %124, %121, %118 : vector<8x8xi1>, vector<8x8xf32>
    %126 = arith.select %124, %122, %119 : vector<8x8xi1>, vector<8x8xf32>
    %127 = arith.select %124, %123, %120 : vector<8x8xi1>, vector<8x8xf32>
    %128 = vector.extract_strided_slice %106 {offsets = [8, 0], sizes = [8, 8], strides = [1, 1]} : vector<16x8xf32> to vector<8x8xf32>
    %129 = vector.extract_strided_slice %107 {offsets = [8, 0], sizes = [8, 8], strides = [1, 1]} : vector<16x8xf32> to vector<8x8xf32>
    %130 = vector.extract_strided_slice %110 {offsets = [8, 0], sizes = [8, 8], strides = [1, 1]} : vector<16x8xf32> to vector<8x8xf32>
    %131 = arith.cmpf ogt, %130, %127 : vector<8x8xf32>
    %132 = arith.select %131, %128, %125 : vector<8x8xi1>, vector<8x8xf32>
    %133 = arith.select %131, %129, %126 : vector<8x8xi1>, vector<8x8xf32>
    %c2_52 = arith.constant 2 : index
    %c0_53 = arith.constant 0 : index
    %c0_54 = arith.constant 0 : index
    %134 = vector.load %arg5[%c2_52, %c0_53, %c0_54] : memref<4x8x8xf32, #tpu.memory_space<vmem>>, vector<1x8x8xf32>
    %135 = vector.shape_cast %134 : vector<1x8x8xf32> to vector<8x8xf32>
    %136 = vector.shape_cast %132 : vector<8x8xf32> to vector<1x8x8xf32>
    tpu.vector_store %arg5[%c2_52, %c0_53, %c0_54], %136 {strides = array<i32>} : memref<4x8x8xf32, #tpu.memory_space<vmem>>, vector<1x8x8xf32>,
    %c2_55 = arith.constant 2 : index
    %c0_56 = arith.constant 0 : index
    %c0_57 = arith.constant 0 : index
    %137 = vector.load %arg6[%c2_55, %c0_56, %c0_57] : memref<4x8x8xf32, #tpu.memory_space<vmem>>, vector<1x8x8xf32>
    %138 = vector.shape_cast %137 : vector<1x8x8xf32> to vector<8x8xf32>
    %139 = vector.shape_cast %133 : vector<8x8xf32> to vector<1x8x8xf32>
    tpu.vector_store %arg6[%c2_55, %c0_56, %c0_57], %139 {strides = array<i32>} : memref<4x8x8xf32, #tpu.memory_space<vmem>>, vector<1x8x8xf32>,
    %c3 = arith.constant 3 : index
    %c0_58 = arith.constant 0 : index
    %c0_59 = arith.constant 0 : index
    %140 = vector.load %arg1[%c3, %c0_58, %c0_59] : memref<4x16x16xf32, #tpu.memory_space<vmem>>, vector<1x16x16xf32>
    %141 = vector.shape_cast %140 : vector<1x16x16xf32> to vector<16x16xf32>
    %c3_60 = arith.constant 3 : index
    %c0_61 = arith.constant 0 : index
    %c0_62 = arith.constant 0 : index
    %142 = vector.load %arg2[%c3_60, %c0_61, %c0_62] : memref<4x16x16xf32, #tpu.memory_space<vmem>>, vector<1x16x16xf32>
    %143 = vector.shape_cast %142 : vector<1x16x16xf32> to vector<16x16xf32>
    %cst_63 = arith.constant dense<0.000000e+00> : vector<16x16xf32>
    %144 = tpu.matmul %0, %141, %cst_63 {dimension_numbers = #tpu.dot_dimension_numbers<[1], [0], [0], [1], [0, 0, 1, 1], [], []>, precision = #tpu.contract_precision<fp32>} : vector<16x16xf32>, vector<16x16xf32>, vector<16x16xf32> -> vector<16x16xf32>
    %cst_64 = arith.constant dense<0.000000e+00> : vector<16x16xf32>
    %145 = tpu.matmul %0, %143, %cst_64 {dimension_numbers = #tpu.dot_dimension_numbers<[1], [0], [0], [1], [0, 0, 1, 1], [], []>, precision = #tpu.contract_precision<fp32>} : vector<16x16xf32>, vector<16x16xf32>, vector<16x16xf32> -> vector<16x16xf32>
    %cst_65 = arith.constant dense<0.000000e+00> : vector<16x8xf32>
    %146 = tpu.matmul %144, %2, %cst_65 {dimension_numbers = #tpu.dot_dimension_numbers<[1], [0], [0], [1], [0, 0, 1, 1], [], []>, precision = #tpu.contract_precision<fp32>} : vector<16x16xf32>, vector<16x8xf32>, vector<16x8xf32> -> vector<16x8xf32>
    %cst_66 = arith.constant dense<0.000000e+00> : vector<16x8xf32>
    %147 = tpu.matmul %145, %2, %cst_66 {dimension_numbers = #tpu.dot_dimension_numbers<[1], [0], [0], [1], [0, 0, 1, 1], [], []>, precision = #tpu.contract_precision<fp32>} : vector<16x16xf32>, vector<16x8xf32>, vector<16x8xf32> -> vector<16x8xf32>
    %148 = arith.mulf %146, %146 : vector<16x8xf32>
    %149 = arith.mulf %147, %147 : vector<16x8xf32>
    %150 = arith.addf %148, %149 : vector<16x8xf32>
    %cst_67 = arith.constant dense<0.000000e+00> : vector<16x8xf32>
    %151 = tpu.matmul %144, %4, %cst_67 {dimension_numbers = #tpu.dot_dimension_numbers<[1], [0], [0], [1], [0, 0, 1, 1], [], []>, precision = #tpu.contract_precision<fp32>} : vector<16x16xf32>, vector<16x8xf32>, vector<16x8xf32> -> vector<16x8xf32>
    %cst_68 = arith.constant dense<0.000000e+00> : vector<16x8xf32>
    %152 = tpu.matmul %145, %4, %cst_68 {dimension_numbers = #tpu.dot_dimension_numbers<[1], [0], [0], [1], [0, 0, 1, 1], [], []>, precision = #tpu.contract_precision<fp32>} : vector<16x16xf32>, vector<16x8xf32>, vector<16x8xf32> -> vector<16x8xf32>
    %153 = arith.mulf %151, %151 : vector<16x8xf32>
    %154 = arith.mulf %152, %152 : vector<16x8xf32>
    %155 = arith.addf %153, %154 : vector<16x8xf32>
    %156 = vector.extract_strided_slice %146 {offsets = [0, 0], sizes = [8, 8], strides = [1, 1]} : vector<16x8xf32> to vector<8x8xf32>
    %157 = vector.extract_strided_slice %147 {offsets = [0, 0], sizes = [8, 8], strides = [1, 1]} : vector<16x8xf32> to vector<8x8xf32>
    %158 = vector.extract_strided_slice %150 {offsets = [0, 0], sizes = [8, 8], strides = [1, 1]} : vector<16x8xf32> to vector<8x8xf32>
    %159 = vector.extract_strided_slice %151 {offsets = [0, 0], sizes = [8, 8], strides = [1, 1]} : vector<16x8xf32> to vector<8x8xf32>
    %160 = vector.extract_strided_slice %152 {offsets = [0, 0], sizes = [8, 8], strides = [1, 1]} : vector<16x8xf32> to vector<8x8xf32>
    %161 = vector.extract_strided_slice %155 {offsets = [0, 0], sizes = [8, 8], strides = [1, 1]} : vector<16x8xf32> to vector<8x8xf32>
    %162 = arith.cmpf ogt, %161, %158 : vector<8x8xf32>
    %163 = arith.select %162, %159, %156 : vector<8x8xi1>, vector<8x8xf32>
    %164 = arith.select %162, %160, %157 : vector<8x8xi1>, vector<8x8xf32>
    %165 = arith.select %162, %161, %158 : vector<8x8xi1>, vector<8x8xf32>
    %166 = vector.extract_strided_slice %146 {offsets = [8, 0], sizes = [8, 8], strides = [1, 1]} : vector<16x8xf32> to vector<8x8xf32>
    %167 = vector.extract_strided_slice %147 {offsets = [8, 0], sizes = [8, 8], strides = [1, 1]} : vector<16x8xf32> to vector<8x8xf32>
    %168 = vector.extract_strided_slice %150 {offsets = [8, 0], sizes = [8, 8], strides = [1, 1]} : vector<16x8xf32> to vector<8x8xf32>
    %169 = arith.cmpf ogt, %168, %165 : vector<8x8xf32>
    %170 = arith.select %169, %166, %163 : vector<8x8xi1>, vector<8x8xf32>
    %171 = arith.select %169, %167, %164 : vector<8x8xi1>, vector<8x8xf32>
    %172 = arith.select %169, %168, %165 : vector<8x8xi1>, vector<8x8xf32>
    %173 = vector.extract_strided_slice %151 {offsets = [8, 0], sizes = [8, 8], strides = [1, 1]} : vector<16x8xf32> to vector<8x8xf32>
    %174 = vector.extract_strided_slice %152 {offsets = [8, 0], sizes = [8, 8], strides = [1, 1]} : vector<16x8xf32> to vector<8x8xf32>
    %175 = vector.extract_strided_slice %155 {offsets = [8, 0], sizes = [8, 8], strides = [1, 1]} : vector<16x8xf32> to vector<8x8xf32>
    %176 = arith.cmpf ogt, %175, %172 : vector<8x8xf32>
    %177 = arith.select %176, %173, %170 : vector<8x8xi1>, vector<8x8xf32>
    %178 = arith.select %176, %174, %171 : vector<8x8xi1>, vector<8x8xf32>
    %c3_69 = arith.constant 3 : index
    %c0_70 = arith.constant 0 : index
    %c0_71 = arith.constant 0 : index
    %179 = vector.load %arg5[%c3_69, %c0_70, %c0_71] : memref<4x8x8xf32, #tpu.memory_space<vmem>>, vector<1x8x8xf32>
    %180 = vector.shape_cast %179 : vector<1x8x8xf32> to vector<8x8xf32>
    %181 = vector.shape_cast %177 : vector<8x8xf32> to vector<1x8x8xf32>
    tpu.vector_store %arg5[%c3_69, %c0_70, %c0_71], %181 {strides = array<i32>} : memref<4x8x8xf32, #tpu.memory_space<vmem>>, vector<1x8x8xf32>,
    %c3_72 = arith.constant 3 : index
    %c0_73 = arith.constant 0 : index
    %c0_74 = arith.constant 0 : index
    %182 = vector.load %arg6[%c3_72, %c0_73, %c0_74] : memref<4x8x8xf32, #tpu.memory_space<vmem>>, vector<1x8x8xf32>
    %183 = vector.shape_cast %182 : vector<1x8x8xf32> to vector<8x8xf32>
    %184 = vector.shape_cast %178 : vector<8x8xf32> to vector<1x8x8xf32>
    tpu.vector_store %arg6[%c3_72, %c0_73, %c0_74], %184 {strides = array<i32>} : memref<4x8x8xf32, #tpu.memory_space<vmem>>, vector<1x8x8xf32>,
    return
  }
  func.func @transform_0(%arg0: i32) -> (i32, i32, i32) {
    %c0_i32 = arith.constant 0 : i32
    %c0_i32_0 = arith.constant 0 : i32
    %c0_i32_1 = arith.constant 0 : i32
    return %arg0, %c0_i32, %c0_i32_0 : i32, i32, i32
  }
  func.func @transform_1(%arg0: i32) -> (i32, i32, i32) {
    %c0_i32 = arith.constant 0 : i32
    %c0_i32_0 = arith.constant 0 : i32
    %c0_i32_1 = arith.constant 0 : i32
    return %arg0, %c0_i32, %c0_i32_0 : i32, i32, i32
  }
  func.func @transform_2(%arg0: i32) -> (i32, i32) {
    %c0_i32 = arith.constant 0 : i32
    %c0_i32_0 = arith.constant 0 : i32
    %c0_i32_1 = arith.constant 0 : i32
    return %c0_i32, %c0_i32_0 : i32, i32
  }
  func.func @transform_3(%arg0: i32) -> (i32, i32, i32) {
    %c0_i32 = arith.constant 0 : i32
    %c0_i32_0 = arith.constant 0 : i32
    %c0_i32_1 = arith.constant 0 : i32
    %c0_i32_2 = arith.constant 0 : i32
    return %c0_i32, %c0_i32_0, %c0_i32_1 : i32, i32, i32
  }
  func.func @transform_4(%arg0: i32) -> (i32, i32, i32) {
    %c0_i32 = arith.constant 0 : i32
    %c0_i32_0 = arith.constant 0 : i32
    %c0_i32_1 = arith.constant 0 : i32
    return %arg0, %c0_i32, %c0_i32_0 : i32, i32, i32
  }
  func.func @transform_5(%arg0: i32) -> (i32, i32, i32) {
    %c0_i32 = arith.constant 0 : i32
    %c0_i32_0 = arith.constant 0 : i32
    %c0_i32_1 = arith.constant 0 : i32
    return %arg0, %c0_i32, %c0_i32_0 : i32, i32, i32
  }
}

</mosaic_0001>

<bundles_post_ra>
// kernel: vector_max_pool.1
= control target key start
LH: loop header
LB: loop body
LE: loop exit
PB: predicated region body
PF: predicated region fallthrough
CT: control target
= control target key end

     0   :  { %s16656_s0 = inlined_call_operand.hbm [shape: f32[8,16,16], index: 0, kind: input, shape index: {}]   ;;  %s16657_s1 = inlined_call_operand.hbm [shape: f32[8,16,16], index: 1, kind: input, shape index: {}]   ;;  %s16658_s2 = inlined_call_operand.hbm [shape: f32[16,16], index: 2, kind: input, shape index: {}]   ;;  %s16659_s3 = inlined_call_operand.hbm [shape: f32[2,16,8], index: 3, kind: input, shape index: {}]   ;;  %s16660_s4 = inlined_call_operand.hbm [shape: f32[8,8,8], index: 4, kind: output, shape index: {0}]   ;;  %s16661_s5 = inlined_call_operand.hbm [shape: f32[8,8,8], index: 5, kind: output, shape index: {1}]  }
   0x1   :  { %16669 = sst [smem:[#allocation19_spill]] %s16656_s0 }
   0x2   :  { %16670 = sst [smem:[#allocation20_spill]] %s16658_s2 }
   0x3   :  { %11 = vsyncpa [#allocation3], 0 }
   0x4   :  { %13 = vsyncpa [#allocation3 + $0x1], 0 }
   0x5   :  { %14 = vsyncpa [#allocation6], 0 }
   0x6   :  { %16 = vsyncpa [#allocation6 + $0x1], 0 }
   0x7   :  { %17 = vsyncpa [#allocation9], 0 }
   0x8   :  { %18 = vsyncpa [#allocation4], 0 }
   0x9   :  { %20 = vsyncpa [#allocation4 + $0x1], 0 }
   0xa   :  { %21 = vsyncpa [#allocation12], 0 }
   0xb   :  { %23 = vsyncpa [#allocation12 + $0x1], 0  ;;  %s15551_s18 = smov 0   ;;  %s15553_s19 = smov 0  }
   0xc   :  { %s15555_s20 = smov 0   ;;  %s15557_s21 = smov 0  }
   0xd LB: > { %s15572_s22 = sadd.s32 4294967295, %s15509_s21   ;;  %s12750_s23 = sadd.s32 4294967294, %s15509_s21   ;;  %s15509_s21 = sphi %s15557_s21, %s16693_s21   ;;  %s15505_s20 = sphi %s15555_s20, %s16692_s20   ;;  %s15501_s19 = sphi %s15553_s19, %s16691_s19   ;;  %s15497_s18 = sphi %s15551_s18, %s16690_s18  }
   0xe   : > { %p49_p0 = scmp.ne.s32.totalorder %s15501_s19, %s15497_s18  ;;  %p16662_p1 = scmp.eq.s32.totalorder %s15572_s22, 0 }
   0xf   : > { %p147_p3 = scmp.eq.s32.totalorder %s12750_s23, 1  ;;  %p12751_p5 = scmp.ge.s32.totalorder %s15509_s21, 1 }
  0x10   : > { %p15581_p4 = por %p16662_p1, %p49_p0  ;;  %p180_p7 = scmp.lt.s32.totalorder %s15509_s21, 3 }
  0x11   : > { %p15586_p6 = por %p147_p3, %p49_p0  ;;  %s15511_s27 = smov [#allocation7]  }
  0x12   : > { %s16671_s24 = scalar_select %p15581_p4, 1, 0 }
  0x13   : > { %s16672_s25 = scalar_select %p15586_p6, 1, 0 }
  0x14   : > { %p15591_p8 = pnand %p12751_p5, %p180_p7  ;;  %s192_s28 = sshll.u32 %s15511_s27, 4  ;;  %s15595_s28 = int_to_ptr.vmem [resolvable:$true] %s192_s28 }
  0x15   : > { %s15512_s30 = smov [#allocation8]   ;;  %s16675_s2 = sld [smem:[#allocation20_spill]] }
  0x16   : > { %p15218_p9 = pneg %p15591_p8  ;;  %s205_s6 = sshll.u32 %s15512_s30, 4  ;;  %s15606_s6 = int_to_ptr.vmem [resolvable:$true] %s205_s6 }
  0x18   : > { %p15602_p11 = pnand %p15218_p9, %p16662_p1 }
  0x1a   : > { %p15285_p13 = pneg %p15602_p11 }
  0x1b   : > { %s15283_s9 = scalar_lea.hbm %s16675_s2, 256 }
  0x1c   : > { %p15284_p12 = scmp.ne.s32.totalorder %s16675_s2, %s15283_s9  ;;  %p15290_p5 = scmp.lt.u32.totalorder %s15283_s9, %s16675_s2 }
  0x1e   : > { %p15286_p0 = pnand %p15285_p13, %p15284_p12 }
  0x20   : > { %p15287_p3 = pneg %p15286_p0 }
  0x22   : > { %p15292_p7 = pnand %p15290_p5, %p15287_p3 }
  0x24   : > { %15295 = shalt.err (!%p15292_p7)
}
  0x25   : > { %s15296_s14 = scalar_lea.vmem %s15595_s28, 256  ;;  %p15304_p2 = scmp.lt.s32.totalorder %s15595_s28, %s15595_s28 }
  0x26   : > { %p15297_p9 = scmp.ne.s32.totalorder %s15595_s28, %s15296_s14  ;;  %p15305_p12 = scmp.lt.s32.totalorder %s15296_s14, %s15296_s14 }
  0x28   : > { %p15299_p10 = pnand %p15297_p9, %p15285_p13  ;;  %p15306_p0 = por %p15305_p12, %p15304_p2 }
  0x2a   : > { %p15300_p1 = pneg %p15299_p10 }
  0x2c   : > { %p15307_p6 = pnand %p15306_p0, %p15300_p1 }
  0x2e   : > { %15310 = shalt.err (!%p15307_p6)
}
  0x2f   : > { %s16663_s15 = smov 128   ;;  %s16665_s16 = smov 8  }
  0x30   : > { %15221 = dma.hbm_to_vmem [thread:$0]  (!%p15602_p11), %s16675_s2, 256, %s15595_s28, [#allocation6], %s16663_s15, %s16663_s15, %s16665_s16  }
  0x31   : > { %s15311_s7 = scalar_lea.hbm %s16659_s3, 512 }
  0x32   : > { %p15312_p1 = scmp.ne.s32.totalorder %s16659_s3, %s15311_s7  ;;  %p15318_p10 = scmp.lt.u32.totalorder %s15311_s7, %s16659_s3 }
  0x34   : > { %p15314_p2 = pnand %p15312_p1, %p15285_p13 }
  0x36   : > { %p15315_p6 = pneg %p15314_p2 }
  0x38   : > { %p15320_p3 = pnand %p15318_p10, %p15315_p6 }
  0x3a   : > { %15323 = shalt.err (!%p15320_p3)
}
  0x3b   : > { %s15324_s28 = scalar_lea.vmem %s15606_s6, 512  ;;  %p15332_p12 = scmp.lt.s32.totalorder %s15606_s6, %s15606_s6 }
  0x3c   : > { %p15325_p5 = scmp.ne.s32.totalorder %s15606_s6, %s15324_s28  ;;  %p15333_p0 = scmp.lt.s32.totalorder %s15324_s28, %s15324_s28 }
  0x3e   : > { %p15327_p7 = pnand %p15325_p5, %p15285_p13  ;;  %p15334_p1 = por %p15333_p0, %p15332_p12 }
  0x40   : > { %p15328_p9 = pneg %p15327_p7 }
  0x42   : > { %p15335_p2 = pnand %p15334_p1, %p15328_p9 }
  0x44   : > { %15338 = shalt.err (!%p15335_p2)
}
  0x45   : > { %15224 = dma.hbm_to_vmem [thread:$0]  (!%p15602_p11), %s16659_s3, 512, %s15606_s6, [#allocation9], %s16663_s15, %s16663_s15, %s16665_s16  }
  0x46   : > { %s15667_s29 = sadd.s32 1, %s15509_s21   ;;  %s36_s14 = sadd.s32 1, %s15505_s20 }
  0x47   : > { %s33_s17 = ssub.s32 %s15509_s21, %s15667_s29  ;;  %p43_p13 = scmp.ne.s32.totalorder %s15505_s20, %s15501_s19 }
  0x48   : > { %p34_p6 = scmp.eq.s32.totalorder %s33_s17, 0  ;;  %p44_p10 = scmp.eq.s32.totalorder %s15509_s21, 0 }
  0x49   : > { %p16676_p3 = scmp.eq.s32.totalorder %s15572_s22, 1  ;;  %p15241_p7 = scmp.lt.s32.totalorder %s15509_s21, 2 }
  0x4a   : > { %s15683_s27 = scalar_select %p34_p6, %s15505_s20, %s36_s14  }
  0x4b   : > { %p15677_p5 = por %p16676_p3, %p43_p13  ;;  %p45_p9 = por %p44_p10, %p43_p13 }
  0x4c   : > { %s219_s30 = sand.u32 1, %s15505_s20   ;;  %s12797_s6 = sshll.u32 %s15509_s21, 10 }
  0x4d   : > { %s16677_s23 = scalar_select %p15677_p5, 1, 0 }
  0x4e   : > { %s12755_s7 = sshll.u32 %s219_s30, 6  ;;  %s16678_s0 = sld [smem:[#allocation19_spill]] }
  0x4f   : > { %s223_s11 = scalar_lea.vmem [#allocation2], %s12755_s7  ;;  %p15694_p11 = pnand %p15241_p7, %p45_p9 }
  0x50   : > { %s231_s28 = sshll.u32 %s223_s11, 4  ;;  %s15701_s17 = scalar_lea.hbm %s16657_s1, %s12797_s6  ;;  %s15692_s28 = int_to_ptr.vmem [resolvable:$true] %s231_s28 }
  0x51   : > { %s245_s8 = scalar_lea.vmem [#allocation5], %s12755_s7  ;;  %s15705_s15 = scalar_lea.sflag [#allocation3], %s219_s30 }
  0x52   : > { %s15703_s9 = sshll.u32 %s245_s8, 4  ;;  %p15341_p0 = pneg %p15694_p11  ;;  %s15737_s9 = int_to_ptr.vmem [resolvable:$true] %s15703_s9 }
  0x54   : > { %s15690_s10 = scalar_lea.hbm %s16678_s0, %s12797_s6  ;;  %s15344_s13 = scalar_lea.hbm %s16678_s0, 2048 }
  0x55   : > { %s15339_s11 = scalar_lea.hbm %s15690_s10, 1024  ;;  %p15345_p13 = scmp.lt.u32.totalorder %s15690_s10, %s16678_s0 }
  0x56   : > { %p15340_p12 = scmp.ne.s32.totalorder %s15690_s10, %s15339_s11  ;;  %p15346_p6 = scmp.lt.u32.totalorder %s15344_s13, %s15339_s11 }
  0x57   : > { %p15348_p3 = scmp.lt.u32.totalorder %s15339_s11, %s15690_s10 }
  0x58   : > { %p15342_p1 = pnand %p15341_p0, %p15340_p12  ;;  %p15347_p10 = por %p15346_p6, %p15345_p13 }
  0x5a   : > { %p15343_p2 = pneg %p15342_p1  ;;  %p15349_p7 = por %p15348_p3, %p15347_p10 }
  0x5c   : > { %p15350_p9 = pnand %p15349_p7, %p15343_p2 }
  0x5e   : > { %15353 = shalt.err (!%p15350_p9)
}
  0x5f   : > { %s15354_s30 = scalar_lea.vmem %s15692_s28, 1024  ;;  %s15515_s2 = smov [#allocation2]  }
  0x60   : > { %p15355_p12 = scmp.ne.s32.totalorder %s15692_s28, %s15354_s30  ;;  %s15359_s16 = sshll.u32 %s15515_s2, 4  ;;  %s15360_s16 = int_to_ptr.vmem [resolvable:$false] %s15359_s16 }
  0x61   : > { %s15361_s7 = scalar_lea.vmem %s15360_s16, 2048  ;;  %p15362_p4 = scmp.lt.s32.totalorder %s15692_s28, %s15360_s16 }
  0x62   : > { %p15357_p1 = pnand %p15355_p12, %p15341_p0  ;;  %p15363_p13 = scmp.lt.s32.totalorder %s15361_s7, %s15354_s30 }
  0x64   : > { %p15358_p5 = pneg %p15357_p1  ;;  %p15364_p6 = por %p15363_p13, %p15362_p4 }
  0x66   : > { %p15365_p10 = pnand %p15364_p6, %p15358_p5 }
  0x68   : > { %15368 = shalt.err (!%p15365_p10)
}
  0x69   : > { %s16680_s8 = smov 8   ;;  %s16681_s11 = smov 128  }
  0x6a   : > { %15228 = dma.hbm_to_vmem [thread:$0]  (!%p15694_p11), %s15690_s10, 1024, %s15692_s28, %s15705_s15, %s16681_s11, %s16681_s11, %s16680_s8  }
  0x6b   : > { %s241_s13 = sand.u32 1, %s15509_s21   ;;  %s15369_s6 = scalar_lea.hbm %s15701_s17, 1024 }
  0x6c   : > { %s15740_s14 = scalar_lea.sflag [#allocation6], %s241_s13  ;;  %p15370_p4 = scmp.ne.s32.totalorder %s15701_s17, %s15369_s6 }
  0x6d   : > { %s15374_s16 = scalar_lea.hbm %s16657_s1, 2048  ;;  %p15375_p3 = scmp.lt.u32.totalorder %s15701_s17, %s16657_s1 }
  0x6e   : > { %p15372_p5 = pnand %p15370_p4, %p15341_p0  ;;  %p15376_p7 = scmp.lt.u32.totalorder %s15374_s16, %s15369_s6 }
  0x6f   : > { %p15378_p12 = scmp.lt.u32.totalorder %s15369_s6, %s15701_s17 }
  0x70   : > { %p15373_p2 = pneg %p15372_p5  ;;  %p15377_p9 = por %p15376_p7, %p15375_p3 }
  0x72   : > { %p15379_p1 = por %p15378_p12, %p15377_p9 }
  0x74   : > { %p15380_p13 = pnand %p15379_p1, %p15373_p2 }
  0x76   : > { %15383 = shalt.err (!%p15380_p13)
}
  0x77   : > { %s15384_s15 = scalar_lea.vmem %s15737_s9, 1024  ;;  %s15516_s10 = smov [#allocation5]  }
  0x78   : > { %p15385_p6 = scmp.ne.s32.totalorder %s15737_s9, %s15384_s15  ;;  %s15389_s28 = sshll.u32 %s15516_s10, 4  ;;  %s15390_s28 = int_to_ptr.vmem [resolvable:$false] %s15389_s28 }
  0x79   : > { %s15391_s0 = scalar_lea.vmem %s15390_s28, 2048  ;;  %p15392_p5 = scmp.lt.s32.totalorder %s15737_s9, %s15390_s28 }
  0x7a   : > { %p15387_p10 = pnand %p15385_p6, %p15341_p0  ;;  %p15393_p3 = scmp.lt.s32.totalorder %s15391_s0, %s15384_s15 }
  0x7c   : > { %p15388_p4 = pneg %p15387_p10  ;;  %p15394_p7 = por %p15393_p3, %p15392_p5 }
  0x7e   : > { %p15395_p9 = pnand %p15394_p7, %p15388_p4 }
  0x80   : > { %15398 = shalt.err (!%p15395_p9)
}
  0x81   : > { %15231 = dma.hbm_to_vmem [thread:$0]  (!%p15694_p11), %s15701_s17, 1024, %s15737_s9, %s15740_s14, %s16681_s11, %s16681_s11, %s16680_s8  }
  0x82   : > { %265 = sbr.rel (%p15591_p8) target bundleno = 1832 (0x728), region = 36  ;;  %s15772_s13 = sand.u32 (!%p15591_p8), 1, %s15501_s19  }
  0x83   : > { %s12764_s6 = sshll.u32 (!%p15591_p8), %s15772_s13, 6  ;;  %s268_s30 = scalar_lea.sflag (!%p15591_p8), [#allocation3], %s15772_s13 }
  0x84   : > { %s15776_s2 = scalar_lea.vmem (!%p15591_p8), [#allocation2], %s12764_s6  ;;  %p16682_p0 = scmp.ne.s32.totalorder (!%p15591_p8), %s16671_s24, 0 }
  0x89   : > { %15472 = dma.done.wait (%p16682_p0), %s268_s30, 1024  }
  0x8a   : > { %15474 = vsyncadd (%p16682_p0), %s268_s30, 4294966272  ;;  %s276_s12 = sand.u32 1, %s15572_s22   ;;  %s15783_s17 = scalar_lea.vmem [#allocation5], %s12764_s6 }
  0x8b   : > { %s277_s26 = scalar_lea.sflag [#allocation6], %s276_s12 }
  0x8c   : > { %15476 = dma.done.wait (%p16682_p0), %s277_s26, 1024  }
  0x8d   : > { %15478 = vsyncadd (%p16682_p0), %s277_s26, 4294966272  ;;  %p16683_p8 = scmp.eq.s32.totalorder %s15572_s22, 0 }
  0x8f   : > { %15480 = dma.done.wait (%p16683_p8), [#allocation6], 256   ;;  %p16684_p11 = pmov %p16683_p8 }
  0x90   : > { %p16685_p2 = pmov %p16683_p8 }
  0x91   : > { %15482 = vsyncadd (%p16684_p11), [#allocation6], 4294967040 }
  0x92   : > { %15484 = dma.done.wait (%p16685_p2), [#allocation9], 512   ;;  %p16686_p12 = pmov %p16685_p2 }
  0x93   : > { %vm340_vm0 = vcmask 130048   ;;  %v336_v0 = vld [vmem:[%s15776_s2] sm:$0xff]  ;;  %v337_v1 = vld [vmem:[%s15776_s2 + $0x8] sm:$0xff]  ;;  %v331_v46 = vld [vmem:[#allocation8] sm:$0xff]  ;;  %s12768_s24 = sshll.u32 %s15772_s13, 5  ;;  %vm3394_vm3 = vcmask 64512  }
  0x94   : > { %15486 = vsyncadd (%p16686_p12), [#allocation9], 4294966784  ;;  %v338_v2 = vld [vmem:[%s15783_s17] sm:$0xff]  ;;  %v348_v3 = vand.u32 4294901760, %v336_v0  ;;  %v351_v4 = vand.u32 4294901760, %v337_v1  ;;  %v339_v5 = vld [vmem:[%s15783_s17 + $0x8] sm:$0xff] }
  0x95   : > { %v850_v6 = vand.u32 4294901760, %v338_v2  ;;  %v329_v7 = vld [vmem:[#allocation7] sm:$0xff]  ;;  %v330_v8 = vld [vmem:[#allocation7 + $0x8] sm:$0xff]  ;;  %v853_v9 = vand.u32 4294901760, %v339_v5  ;;  %v332_v47 = vld [vmem:[#allocation8 + $0x8] sm:$0xff]  ;;  %v1358_v48 = vand.u32 4294901760, %v331_v46 }
  0x96   : > { %v342_v10 = vsel %vm340_vm0, %v329_v7, 0  ;;  %v345_v11 = vsel %vm340_vm0, %v330_v8, 0  ;;  %v15803_v12 = vpack.c.bf16 %v351_v4, %v348_v3  ;;  %v436_v15 = vsub.f32 %v336_v0, %v348_v3  ;;  %s16075_s9 = scalar_lea.vmem [#allocation10], %s12768_s24  ;;  %s16079_s8 = scalar_lea.vmem [#allocation11], %s12768_s24 }
  0x97   : > { %v15805_v13 = vand.u32 4294901760, %v342_v10  ;;  %v15807_v14 = vand.u32 4294901760, %v345_v11  ;;  %v15809_v16 = vpack.c.bf16 %v853_v9, %v850_v6  ;;  %v443_v17 = vsub.f32 %v337_v1, %v351_v4  ;;  %s12603_s11 = sshll.u32 %s16079_s8, 4  ;;  %s12800_s14 = sshll.u32 %s15572_s22, 9  ;;  %s16566_s11 = int_to_ptr.vmem [resolvable:$true] %s12603_s11 }
  0x98   : > { %v938_v18 = vsub.f32 %v338_v2, %v850_v6  ;;  %v945_v19 = vsub.f32 %v339_v5, %v853_v9  ;;  %14387 = vmatprep.subr.bf16.mxu0 %v15803_v12  ;;  %v437_v22 = vand.u32 4294901760, %v436_v15  ;;  %v1361_v49 = vand.u32 4294901760, %v332_v47  ;;  %s12587_s16 = sshll.u32 %s16075_s9, 4  ;;  %s16571_s10 = scalar_lea.hbm %s16660_s4, %s12800_s14  ;;  %s16573_s16 = int_to_ptr.vmem [resolvable:$true] %s12587_s16 }
  0x99   : > { %v15813_v20 = vsub.f32 %v342_v10, %v15805_v13  ;;  %v15816_v21 = vsub.f32 %v345_v11, %v15807_v14  ;;  %14411 = vmatprep.subr.bf16.mxu1 %v15809_v16  ;;  %14389 = vmatpush3.bf16.msra.mxu0 %v15803_v12  ;;  %v444_v23 = vand.u32 4294901760, %v443_v17  ;;  %v14394_v42 = vpack.c.bf16 %v443_v17, %v436_v15  ;;  %s16578_s0 = scalar_lea.hbm %s16661_s5, %s12800_s14  ;;  %s12569_s6 = scalar_lea.sflag [#allocation4], %s15772_s13 }
  0x9a   : > { %v939_v24 = vand.u32 4294901760, %v938_v18  ;;  %v946_v25 = vand.u32 4294901760, %v945_v19  ;;  %14413 = vmatpush3.bf16.msra.mxu1 %v15809_v16  ;;  %v438_v28 = vsub.f32 %v436_v15, %v437_v22  ;;  %v14418_v43 = vpack.c.bf16 %v945_v19, %v938_v18  ;;  %s15399_s30 = scalar_lea.vmem %s16573_s16, 512  ;;  %p16687_p13 = scmp.ne.s32.totalorder %s16677_s23, 0 }
  0x9b   : > { %v15822_v26 = vand.u32 4294901760, %v15813_v20  ;;  %v15825_v27 = vand.u32 4294901760, %v15816_v21  ;;  %v445_v29 = vsub.f32 %v443_v17, %v444_v23  ;;  %v14402_v44 = vpack.c.bf16 %v444_v23, %v437_v22  ;;  %p15400_p1 = scmp.ne.s32.totalorder %s16573_s16, %s15399_s30 }
  0x9c   : > { %v940_v30 = vsub.f32 %v938_v18, %v939_v24  ;;  %v947_v31 = vsub.f32 %v945_v19, %v946_v25  ;;  %v439_v34 = vand.u32 4294901760, %v438_v28  ;;  %v14426_v45 = vpack.c.bf16 %v946_v25, %v939_v24 }
  0x9d   : > { %v417_v32 = vsub.f32 %v15813_v20, %v15822_v26  ;;  %v427_v33 = vsub.f32 %v15816_v21, %v15825_v27  ;;  %v446_v35 = vand.u32 4294901760, %v445_v29  ;;  %v15867_v50 = vpack.c.bf16 %v1361_v49, %v1358_v48  ;;  %p15401_p6 = pnand %p15400_p1, %p16687_p13 }
  0x9e   : > { %v941_v36 = vand.u32 4294901760, %v940_v30  ;;  %v948_v37 = vand.u32 4294901760, %v947_v31  ;;  %v1446_v51 = vsub.f32 %v331_v46, %v1358_v48  ;;  %v1453_v52 = vsub.f32 %v332_v47, %v1361_v49 }
  0x9f   : > { %v15831_v38 = vand.u32 4294901760, %v417_v32  ;;  %v15833_v39 = vand.u32 4294901760, %v427_v33  ;;  %v14390_v40 = vpack.c.bf16 %v446_v35, %v439_v34  ;;  %v334_v32 = vld [vmem:[#allocation8 + $0x10] sm:$0xff]  ;;  %v335_v33 = vld [vmem:[#allocation8 + $0x18] sm:$0xff]  ;;  %p15402_p10 = pneg %p15401_p6 }
  0xa0   : > { %v14414_v41 = vpack.c.bf16 %v948_v37, %v941_v36  ;;  %v1447_v53 = vand.u32 4294901760, %v1446_v51  ;;  %v1454_v54 = vand.u32 4294901760, %v1453_v52  ;;  %v15877_v60 = vpack.c.bf16 %v1453_v52, %v1446_v51 }
  0xa1   : > { %13382 = vmatprep.mubr.f32.mxu0 %v15831_v38  ;;  %13424 = vmatprep.mubr.f32.mxu1 %v15831_v38  ;;  %v2374_v34 = vand.u32 4294901760, %v334_v32  ;;  %v2377_v35 = vand.u32 4294901760, %v335_v33 }
  0xa2   : > { %13383 = vmatmul.mubr.f32.vlgmr.msra.gmra.mrb[0].mxu0 %v15833_v39  ;;  %14391 = vmatprep.subr.bf16.mxu0 %v14390_v40  ;;  %v1448_v55 = vsub.f32 %v1446_v51, %v1447_v53  ;;  %v1455_v56 = vsub.f32 %v1453_v52, %v1454_v54  ;;  %v15879_v61 = vpack.c.bf16 %v1454_v54, %v1447_v53  ;;  %v12770_v51 = vld [vmem:[%s15776_s2 + $0x10] sm:$0xff]  ;;  %v12771_v52 = vld [vmem:[%s15776_s2 + $0x18] sm:$0xff] }
  0xa3   : > { %13425 = vmatmul.mubr.f32.vlgmr.msra.gmra.mrb[0].mxu1 %v15833_v39  ;;  %14415 = vmatprep.subr.bf16.mxu1 %v14414_v41  ;;  %v2462_v36 = vsub.f32 %v334_v32, %v2374_v34  ;;  %v2469_v37 = vsub.f32 %v335_v33, %v2377_v35  ;;  %v12772_v53 = vld [vmem:[%s15783_s17 + $0x10] sm:$0xff]  ;;  %v12773_v54 = vld [vmem:[%s15783_s17 + $0x18] sm:$0xff] }
  0xa4   : > { %14393 = vmatpush3.bf16.msra.mxu0 %v14390_v40  ;;  %14417 = vmatpush3.bf16.msra.mxu1 %v14414_v41  ;;  %v1449_v57 = vand.u32 4294901760, %v1448_v55  ;;  %v1456_v58 = vand.u32 4294901760, %v1455_v56  ;;  %v3404_v55 = vand.u32 4294901760, %v12770_v51  ;;  %v3407_v56 = vand.u32 4294901760, %v12771_v52 }
  0xa5   : > { %13389 = vmatprep.mubr.f32.mxu0 %v15805_v13  ;;  %13431 = vmatprep.mubr.f32.mxu1 %v15805_v13  ;;  %v2463_v40 = vand.u32 4294901760, %v2462_v36  ;;  %v2470_v41 = vand.u32 4294901760, %v2469_v37  ;;  %v15982_v48 = vpack.c.bf16 %v2469_v37, %v2462_v36 }
  0xa6   : > { %14395 = vmatprep.subr.bf16.mxu0 %v14394_v42  ;;  %14419 = vmatprep.subr.bf16.mxu1 %v14418_v43  ;;  %v15873_v59 = vpack.c.bf16 %v1456_v58, %v1449_v57  ;;  %v3906_v57 = vand.u32 4294901760, %v12772_v53  ;;  %v3909_v58 = vand.u32 4294901760, %v12773_v54 }
  0xa7   : > { %v16001_v49 = vpack.c.bf16 %v2470_v41, %v2463_v40 }
  0xaa   : > { %13390 = vmatmul.mubr.f32.vlgmr.msra.gmra.mrb[0].mxu0 %v15807_v14 }
  0xab   : > { %13432 = vmatmul.mubr.f32.vlgmr.msra.gmra.mrb[0].mxu1 %v15807_v14  ;;  %14397 = vmatpush3.bf16.msra.mxu0 %v14394_v42  ;;  %v15964_v42 = vpack.c.bf16 %v2377_v35, %v2374_v34 }
  0xac   : > { %14421 = vmatpush3.bf16.msra.mxu1 %v14418_v43  ;;  %13396 = vmatprep.mubr.f32.mxu0 %v15813_v20  ;;  %v2464_v43 = vsub.f32 %v2462_v36, %v2463_v40 }
  0xad   : > { %13438 = vmatprep.mubr.f32.mxu1 %v15813_v20  ;;  %14399 = vmatprep.subr.bf16.mxu0 %v15803_v12 }
  0xae   : > { %14423 = vmatprep.subr.bf16.mxu1 %v15809_v16 }
  0xb2   : > { %13397 = vmatmul.mubr.f32.vlgmr.msra.gmra.mrb[0].mxu0 %v15816_v21 }
  0xb3   : > { %13439 = vmatmul.mubr.f32.vlgmr.msra.gmra.mrb[0].mxu1 %v15816_v21  ;;  %14401 = vmatpush3.bf16.msra.mxu0 %v15803_v12 }
  0xb4   : > { %14425 = vmatpush3.bf16.msra.mxu1 %v15809_v16  ;;  %13403 = vmatprep.mubr.f32.mxu0 %v15822_v26 }
  0xb5   : > { %13445 = vmatprep.mubr.f32.mxu1 %v15822_v26  ;;  %14403 = vmatprep.subr.bf16.mxu0 %v14402_v44 }
  0xb6   : > { %14427 = vmatprep.subr.bf16.mxu1 %v14426_v45 }
  0xba   : > { %13404 = vmatmul.mubr.f32.vlgmr.msra.gmra.mrb[0].mxu0 %v15825_v27 }
  0xbb   : > { %13446 = vmatmul.mubr.f32.vlgmr.msra.gmra.mrb[0].mxu1 %v15825_v27  ;;  %14405 = vmatpush3.bf16.msra.mxu0 %v14402_v44  ;;  %v2471_v44 = vsub.f32 %v2469_v37, %v2470_v41 }
  0xbc   : > { %14429 = vmatpush3.bf16.msra.mxu1 %v14426_v45  ;;  %13410 = vmatprep.mubr.f32.mxu0 %v15805_v13  ;;  %v2465_v45 = vand.u32 4294901760, %v2464_v43 }
  0xbd   : > { %13452 = vmatprep.mubr.f32.mxu1 %v15805_v13  ;;  %14407 = vmatprep.subr.bf16.mxu0 %v15803_v12  ;;  %v2472_v46 = vand.u32 4294901760, %v2471_v44 }
  0xbe   : > { %14431 = vmatprep.subr.bf16.mxu1 %v15809_v16 }
  0xbf   : > { %v15974_v47 = vpack.c.bf16 %v2472_v46, %v2465_v45 }
  0xc2   : > { %13411 = vmatmul.mubr.f32.vlgmr.msra.gmra.mrb[0].mxu0 %v15807_v14 }
  0xc3   : > { %13453 = vmatmul.mubr.f32.vlgmr.msra.gmra.mrb[0].mxu1 %v15807_v14  ;;  %14409 = vmatpush3.bf16.msra.mxu0 %v15803_v12 }
  0xc4   : > { %14433 = vmatpush3.bf16.msra.mxu1 %v15809_v16  ;;  %13417 = vmatprep.mubr.f32.mxu0 %v15805_v13 }
  0xc5   : > { %13459 = vmatprep.mubr.f32.mxu1 %v15805_v13  ;;  %14435 = vmatprep.subr.bf16.mxu0 %v15867_v50 }
  0xc6   : > { %14459 = vmatprep.subr.bf16.mxu1 %v15867_v50 }
  0xca   : > { %13418 = vmatmul.mubr.f32.vlgmr.msra.gmra.mrb[0].mxu0 %v15807_v14 }
  0xcb   : > { %13460 = vmatmul.mubr.f32.vlgmr.msra.gmra.mrb[0].mxu1 %v15807_v14  ;;  %14437 = vmatpush3.bf16.msra.mxu0 %v15867_v50 }
  0xcc   : > { %14461 = vmatpush3.bf16.msra.mxu1 %v15867_v50  ;;  %14439 = vmatprep.subr.bf16.mxu0 %v15873_v59 }
  0xcd   : > { %14463 = vmatprep.subr.bf16.mxu1 %v15873_v59 }
 0x19d   : > { %v13419_v62 = vpop.f32.mrb[0].mxu0 }
 0x19e   : > { %v1355_v63 = vsel %vm340_vm0, %v13419_v62, 0  ;;  %v13461_v0 = vpop.f32.mrb[0].mxu1  ;;  %v839_v1 = vpop.f32.mrb[1].mxu0  ;;  %v16015_v62 = vsub.f32 %v12770_v51, %v3404_v55 }
 0x19f   : > { %v15882_v2 = vand.u32 4294901760, %v1355_v63  ;;  %v1863_v3 = vsel %vm340_vm0, %v13461_v0, 0  ;;  %v1352_v4 = vsel %vm340_vm0, %v839_v1, 0  ;;  %v1341_v5 = vpop.f32.mrb[1].mxu1  ;;  %v3994_v0 = vsub.f32 %v12772_v53, %v3906_v57 }
 0x1a0   : > { %v15886_v6 = vand.u32 4294901760, %v1863_v3  ;;  %v15888_v7 = vand.u32 4294901760, %v1352_v4  ;;  %v1860_v8 = vsel %vm340_vm0, %v1341_v5, 0  ;;  %v4001_v1 = vsub.f32 %v12773_v54, %v3909_v58 }
 0x1a1   : > { %v15892_v9 = vsub.f32 %v1355_v63, %v15882_v2  ;;  %v15894_v10 = vand.u32 4294901760, %v1860_v8  ;;  %v3499_v63 = vsub.f32 %v12771_v52, %v3407_v56  ;;  %v3995_v5 = vand.u32 4294901760, %v3994_v0 }
 0x1a2   : > { %v15897_v11 = vsub.f32 %v1863_v3, %v15886_v6  ;;  %v15900_v12 = vsub.f32 %v1352_v4, %v15888_v7  ;;  %v3493_v3 = vand.u32 4294901760, %v16015_v62 }
 0x1a3   : > { %v15903_v15 = vand.u32 4294901760, %v15892_v9  ;;  %v15906_v16 = vsub.f32 %v1860_v8, %v15894_v10  ;;  %v3500_v4 = vand.u32 4294901760, %v3499_v63  ;;  %v4002_v8 = vand.u32 4294901760, %v4001_v1 }
 0x1a4   : > { %v15909_v17 = vand.u32 4294901760, %v15897_v11  ;;  %v15912_v18 = vand.u32 4294901760, %v15900_v12 }
 0x1a5   : > { %v15915_v19 = vand.u32 4294901760, %v15906_v16  ;;  %v1437_v22 = vsub.f32 %v15892_v9, %v15903_v15 }
 0x1a6   : > { %v1427_v23 = vsub.f32 %v15900_v12, %v15912_v18  ;;  %v1945_v24 = vsub.f32 %v15897_v11, %v15909_v17 }
 0x1a7   : > { %v1935_v25 = vsub.f32 %v15906_v16, %v15915_v19  ;;  %v15927_v30 = vand.u32 4294901760, %v1437_v22 }
 0x1a8   : > { %v1428_v28 = vand.u32 4294901760, %v1427_v23  ;;  %v15929_v31 = vand.u32 4294901760, %v1945_v24 }
 0x1a9   : > { %v15925_v29 = vand.u32 4294901760, %v1935_v25 }
 0x1aa   : > { %13466 = vmatprep.mubr.f32.mxu0 %v1428_v28 }
 0x1ab   : > { %13508 = vmatprep.mubr.f32.mxu1 %v15925_v29  ;;  %13467 = vmatmul.mubr.f32.vlgmr.msra.gmra.mrb[2].mxu0 %v15927_v30 }
 0x1ac   : > { %13509 = vmatmul.mubr.f32.vlgmr.msra.gmra.mrb[2].mxu1 %v15929_v31  ;;  %14441 = vmatpush3.bf16.msra.mxu0 %v15873_v59 }
 0x1ad   : > { %13473 = vmatprep.mubr.f32.mxu0 %v15888_v7  ;;  %14465 = vmatpush3.bf16.msra.mxu1 %v15873_v59 }
 0x1ae   : > { %13515 = vmatprep.mubr.f32.mxu1 %v15894_v10  ;;  %14443 = vmatprep.subr.bf16.mxu0 %v15877_v60 }
 0x1af   : > { %14467 = vmatprep.subr.bf16.mxu1 %v15877_v60 }
 0x1b3   : > { %13474 = vmatmul.mubr.f32.vlgmr.msra.gmra.mrb[2].mxu0 %v15882_v2 }
 0x1b4   : > { %13516 = vmatmul.mubr.f32.vlgmr.msra.gmra.mrb[2].mxu1 %v15886_v6  ;;  %14445 = vmatpush3.bf16.msra.mxu0 %v15877_v60 }
 0x1b5   : > { %13480 = vmatprep.mubr.f32.mxu0 %v15900_v12  ;;  %14469 = vmatpush3.bf16.msra.mxu1 %v15877_v60 }
 0x1b6   : > { %13522 = vmatprep.mubr.f32.mxu1 %v15906_v16  ;;  %14447 = vmatprep.subr.bf16.mxu0 %v15867_v50 }
 0x1b7   : > { %14471 = vmatprep.subr.bf16.mxu1 %v15867_v50 }
 0x1bb   : > { %13481 = vmatmul.mubr.f32.vlgmr.msra.gmra.mrb[2].mxu0 %v15892_v9 }
 0x1bc   : > { %13523 = vmatmul.mubr.f32.vlgmr.msra.gmra.mrb[2].mxu1 %v15897_v11  ;;  %14449 = vmatpush3.bf16.msra.mxu0 %v15867_v50 }
 0x1bd   : > { %13487 = vmatprep.mubr.f32.mxu0 %v15912_v18  ;;  %14473 = vmatpush3.bf16.msra.mxu1 %v15867_v50 }
 0x1be   : > { %13529 = vmatprep.mubr.f32.mxu1 %v15915_v19  ;;  %14451 = vmatprep.subr.bf16.mxu0 %v15879_v61 }
 0x1bf   : > { %14475 = vmatprep.subr.bf16.mxu1 %v15879_v61 }
 0x1c3   : > { %13488 = vmatmul.mubr.f32.vlgmr.msra.gmra.mrb[2].mxu0 %v15903_v15 }
 0x1c4   : > { %13530 = vmatmul.mubr.f32.vlgmr.msra.gmra.mrb[2].mxu1 %v15909_v17  ;;  %14453 = vmatpush3.bf16.msra.mxu0 %v15879_v61 }
 0x1c5   : > { %13494 = vmatprep.mubr.f32.mxu0 %v15888_v7  ;;  %14477 = vmatpush3.bf16.msra.mxu1 %v15879_v61 }
 0x1c6   : > { %13536 = vmatprep.mubr.f32.mxu1 %v15894_v10  ;;  %14455 = vmatprep.subr.bf16.mxu0 %v15867_v50 }
 0x1c7   : > { %14479 = vmatprep.subr.bf16.mxu1 %v15867_v50 }
 0x1cb   : > { %13495 = vmatmul.mubr.f32.vlgmr.msra.gmra.mrb[2].mxu0 %v15882_v2 }
 0x1cc   : > { %13537 = vmatmul.mubr.f32.vlgmr.msra.gmra.mrb[2].mxu1 %v15886_v6  ;;  %14457 = vmatpush3.bf16.msra.mxu0 %v15867_v50 }
 0x1cd   : > { %13501 = vmatprep.mubr.f32.mxu0 %v15888_v7  ;;  %14481 = vmatpush3.bf16.msra.mxu1 %v15867_v50 }
 0x1ce   : > { %13543 = vmatprep.mubr.f32.mxu1 %v15894_v10  ;;  %14483 = vmatprep.subr.bf16.mxu0 %v15964_v42 }
 0x1cf   : > { %14507 = vmatprep.subr.bf16.mxu1 %v15964_v42 }
 0x1d3   : > { %13502 = vmatmul.mubr.f32.vlgmr.msra.gmra.mrb[2].mxu0 %v15882_v2 }
 0x1d4   : > { %13544 = vmatmul.mubr.f32.vlgmr.msra.gmra.mrb[2].mxu1 %v15886_v6  ;;  %14485 = vmatpush3.bf16.msra.mxu0 %v15964_v42 }
 0x1d5   : > { %13550 = vmatprep.mubr.f32.mxu0 %v1428_v28  ;;  %14509 = vmatpush3.bf16.msra.mxu1 %v15964_v42 }
 0x1d6   : > { %13592 = vmatprep.mubr.f32.mxu1 %v15925_v29  ;;  %14487 = vmatprep.subr.bf16.mxu0 %v15974_v47 }
 0x1d7   : > { %13551 = vmatmul.mubr.f32.vlgmr.msra.gmra.mrb[4].mxu0 %v15927_v30  ;;  %14511 = vmatprep.subr.bf16.mxu1 %v15974_v47 }
 0x1d8   : > { %13593 = vmatmul.mubr.f32.vlgmr.msra.gmra.mrb[4].mxu1 %v15929_v31  ;;  %14489 = vmatpush3.bf16.msra.mxu0 %v15974_v47 }
 0x1d9   : > { %13557 = vmatprep.mubr.f32.mxu0 %v15888_v7  ;;  %14513 = vmatpush3.bf16.msra.mxu1 %v15974_v47 }
 0x1da   : > { %13599 = vmatprep.mubr.f32.mxu1 %v15894_v10  ;;  %14491 = vmatprep.subr.bf16.mxu0 %v15982_v48 }
 0x1db   : > { %14515 = vmatprep.subr.bf16.mxu1 %v15982_v48 }
 0x1df   : > { %13558 = vmatmul.mubr.f32.vlgmr.msra.gmra.mrb[4].mxu0 %v15882_v2 }
 0x1e0   : > { %13600 = vmatmul.mubr.f32.vlgmr.msra.gmra.mrb[4].mxu1 %v15886_v6  ;;  %14493 = vmatpush3.bf16.msra.mxu0 %v15982_v48 }
 0x1e1   : > { %13564 = vmatprep.mubr.f32.mxu0 %v15900_v12  ;;  %14517 = vmatpush3.bf16.msra.mxu1 %v15982_v48  ;;  %v3501_v12 = vsub.f32 %v3499_v63, %v3500_v4 }
 0x1e2   : > { %13606 = vmatprep.mubr.f32.mxu1 %v15906_v16  ;;  %14495 = vmatprep.subr.bf16.mxu0 %v15964_v42  ;;  %v3996_v16 = vsub.f32 %v3994_v0, %v3995_v5 }
 0x1e3   : > { %14519 = vmatprep.subr.bf16.mxu1 %v15964_v42 }
 0x1e4   : > { %v3997_v22 = vand.u32 4294901760, %v3996_v16 }
 0x1e7   : > { %13565 = vmatmul.mubr.f32.vlgmr.msra.gmra.mrb[4].mxu0 %v15892_v9  ;;  %v16026_v9 = vpack.c.bf16 %v3407_v56, %v3404_v55 }
 0x1e8   : > { %13607 = vmatmul.mubr.f32.vlgmr.msra.gmra.mrb[4].mxu1 %v15897_v11  ;;  %14497 = vmatpush3.bf16.msra.mxu0 %v15964_v42  ;;  %v3494_v11 = vsub.f32 %v16015_v62, %v3493_v3 }
 0x1e9   : > { %13571 = vmatprep.mubr.f32.mxu0 %v15912_v18  ;;  %14521 = vmatpush3.bf16.msra.mxu1 %v15964_v42 }
 0x1ea   : > { %13613 = vmatprep.mubr.f32.mxu1 %v15915_v19  ;;  %14499 = vmatprep.subr.bf16.mxu0 %v16001_v49  ;;  %v3495_v18 = vand.u32 4294901760, %v3494_v11  ;;  %v3502_v19 = vand.u32 4294901760, %v3501_v12 }
 0x1eb   : > { %14523 = vmatprep.subr.bf16.mxu1 %v16001_v49 }
 0x1ec   : > { %v14534_v24 = vpack.c.bf16 %v3502_v19, %v3495_v18 }
 0x1ef   : > { %13572 = vmatmul.mubr.f32.vlgmr.msra.gmra.mrb[4].mxu0 %v15903_v15  ;;  %v14554_v15 = vpack.c.bf16 %v3909_v58, %v3906_v57 }
 0x1f0   : > { %13614 = vmatmul.mubr.f32.vlgmr.msra.gmra.mrb[4].mxu1 %v15909_v17  ;;  %14501 = vmatpush3.bf16.msra.mxu0 %v16001_v49  ;;  %v4003_v17 = vsub.f32 %v4001_v1, %v4002_v8 }
 0x1f1   : > { %13578 = vmatprep.mubr.f32.mxu0 %v15888_v7  ;;  %14525 = vmatpush3.bf16.msra.mxu1 %v16001_v49 }
 0x1f2   : > { %13620 = vmatprep.mubr.f32.mxu1 %v15894_v10  ;;  %14503 = vmatprep.subr.bf16.mxu0 %v15964_v42  ;;  %v4004_v23 = vand.u32 4294901760, %v4003_v17 }
 0x1f3   : > { %14527 = vmatprep.subr.bf16.mxu1 %v15964_v42 }
 0x1f4   : > { %v14558_v25 = vpack.c.bf16 %v4004_v23, %v3997_v22 }
 0x1f7   : > { %13579 = vmatmul.mubr.f32.vlgmr.msra.gmra.mrb[4].mxu0 %v15882_v2 }
 0x1f8   : > { %13621 = vmatmul.mubr.f32.vlgmr.msra.gmra.mrb[4].mxu1 %v15886_v6  ;;  %14505 = vmatpush3.bf16.msra.mxu0 %v15964_v42 }
 0x1f9   : > { %13585 = vmatprep.mubr.f32.mxu0 %v15888_v7  ;;  %14529 = vmatpush3.bf16.msra.mxu1 %v15964_v42  ;;  %v14538_v7 = vpack.c.bf16 %v3499_v63, %v16015_v62 }
 0x1fa   : > { %13627 = vmatprep.mubr.f32.mxu1 %v15894_v10  ;;  %14531 = vmatprep.subr.bf16.mxu0 %v16026_v9  ;;  %v14562_v10 = vpack.c.bf16 %v4001_v1, %v3994_v0 }
 0x1fb   : > { %14555 = vmatprep.subr.bf16.mxu1 %v14554_v15 }
 0x1ff   : > { %13586 = vmatmul.mubr.f32.vlgmr.msra.gmra.mrb[4].mxu0 %v15882_v2  ;;  %v14546_v2 = vpack.c.bf16 %v3500_v4, %v3493_v3 }
 0x200   : > { %13628 = vmatmul.mubr.f32.vlgmr.msra.gmra.mrb[4].mxu1 %v15886_v6  ;;  %14533 = vmatpush3.bf16.msra.mxu0 %v16026_v9  ;;  %v14570_v6 = vpack.c.bf16 %v4002_v8, %v3995_v5 }
 0x201   : > { %14557 = vmatpush3.bf16.msra.mxu1 %v14554_v15  ;;  %13634 = vmatprep.mubr.f32.mxu0 %v15831_v38 }
 0x202   : > { %13676 = vmatprep.mubr.f32.mxu1 %v15831_v38  ;;  %14535 = vmatprep.subr.bf16.mxu0 %v14534_v24 }
 0x203   : > { %13635 = vmatmul.mubr.f32.vlgmr.msra.gmra.mrb[6].mxu0 %v15833_v39  ;;  %14559 = vmatprep.subr.bf16.mxu1 %v14558_v25 }
 0x204   : > { %13677 = vmatmul.mubr.f32.vlgmr.msra.gmra.mrb[6].mxu1 %v15833_v39  ;;  %14537 = vmatpush3.bf16.msra.mxu0 %v14534_v24 }
 0x205   : > { %14561 = vmatpush3.bf16.msra.mxu1 %v14558_v25  ;;  %13641 = vmatprep.mubr.f32.mxu0 %v15805_v13 }
 0x206   : > { %13683 = vmatprep.mubr.f32.mxu1 %v15805_v13  ;;  %14539 = vmatprep.subr.bf16.mxu0 %v14538_v7 }
 0x207   : > { %14563 = vmatprep.subr.bf16.mxu1 %v14562_v10 }
 0x20b   : > { %13642 = vmatmul.mubr.f32.vlgmr.msra.gmra.mrb[6].mxu0 %v15807_v14 }
 0x20c   : > { %13684 = vmatmul.mubr.f32.vlgmr.msra.gmra.mrb[6].mxu1 %v15807_v14  ;;  %14541 = vmatpush3.bf16.msra.mxu0 %v14538_v7 }
 0x20d   : > { %14565 = vmatpush3.bf16.msra.mxu1 %v14562_v10  ;;  %13648 = vmatprep.mubr.f32.mxu0 %v15813_v20 }
 0x20e   : > { %13690 = vmatprep.mubr.f32.mxu1 %v15813_v20  ;;  %14543 = vmatprep.subr.bf16.mxu0 %v16026_v9 }
 0x20f   : > { %14567 = vmatprep.subr.bf16.mxu1 %v14554_v15 }
 0x213   : > { %13649 = vmatmul.mubr.f32.vlgmr.msra.gmra.mrb[6].mxu0 %v15816_v21 }
 0x214   : > { %13691 = vmatmul.mubr.f32.vlgmr.msra.gmra.mrb[6].mxu1 %v15816_v21  ;;  %14545 = vmatpush3.bf16.msra.mxu0 %v16026_v9 }
 0x215   : > { %14569 = vmatpush3.bf16.msra.mxu1 %v14554_v15  ;;  %13655 = vmatprep.mubr.f32.mxu0 %v15822_v26 }
 0x216   : > { %13697 = vmatprep.mubr.f32.mxu1 %v15822_v26  ;;  %14547 = vmatprep.subr.bf16.mxu0 %v14546_v2 }
 0x217   : > { %14571 = vmatprep.subr.bf16.mxu1 %v14570_v6 }
 0x21b   : > { %13656 = vmatmul.mubr.f32.vlgmr.msra.gmra.mrb[6].mxu0 %v15825_v27 }
 0x21c   : > { %13698 = vmatmul.mubr.f32.vlgmr.msra.gmra.mrb[6].mxu1 %v15825_v27  ;;  %14549 = vmatpush3.bf16.msra.mxu0 %v14546_v2 }
 0x21d   : > { %14573 = vmatpush3.bf16.msra.mxu1 %v14570_v6  ;;  %13662 = vmatprep.mubr.f32.mxu0 %v15805_v13 }
 0x21e   : > { %13704 = vmatprep.mubr.f32.mxu1 %v15805_v13  ;;  %14551 = vmatprep.subr.bf16.mxu0 %v16026_v9 }
 0x21f   : > { %14575 = vmatprep.subr.bf16.mxu1 %v14554_v15 }
 0x223   : > { %13663 = vmatmul.mubr.f32.vlgmr.msra.gmra.mrb[6].mxu0 %v15807_v14 }
 0x224   : > { %13705 = vmatmul.mubr.f32.vlgmr.msra.gmra.mrb[6].mxu1 %v15807_v14  ;;  %14553 = vmatpush3.bf16.msra.mxu0 %v16026_v9 }
 0x225   : > { %14577 = vmatpush3.bf16.msra.mxu1 %v14554_v15  ;;  %13669 = vmatprep.mubr.f32.mxu0 %v15805_v13 }
 0x226   : > { %13711 = vmatprep.mubr.f32.mxu1 %v15805_v13  ;;  %14579 = vmatprep.subr.bf16.mxu0 %v15867_v50 }
 0x227   : > { %14603 = vmatprep.subr.bf16.mxu1 %v15867_v50 }
 0x22b   : > { %13670 = vmatmul.mubr.f32.vlgmr.msra.gmra.mrb[6].mxu0 %v15807_v14 }
 0x22c   : > { %13712 = vmatmul.mubr.f32.vlgmr.msra.gmra.mrb[6].mxu1 %v15807_v14  ;;  %14581 = vmatpush3.bf16.msra.mxu0 %v15867_v50 }
 0x22d   : > { %14605 = vmatpush3.bf16.msra.mxu1 %v15867_v50  ;;  %14583 = vmatprep.subr.bf16.mxu0 %v15873_v59 }
 0x22e   : > { %14607 = vmatprep.subr.bf16.mxu1 %v15873_v59 }
 0x2a6   : > { %v13503_v28 = vpop.f32.mrb[2].mxu0 }
 0x2a7   : > { %v2368_v29 = vmul.f32 %v13503_v28, %v13503_v28  ;;  %v13545_v30 = vpop.f32.mrb[2].mxu1  ;;  %v1849_v31 = vpop.f32.mrb[3].mxu0 }
 0x2a8   : > { %v2370_v32 = vmul.f32 %v13545_v30, %v13545_v30  ;;  %v2367_v33 = vmul.f32 %v1849_v31, %v1849_v31  ;;  %v2357_v34 = vpop.f32.mrb[3].mxu1 }
 0x2a9   : > { %v2369_v35 = vmul.f32 %v2357_v34, %v2357_v34 }
 0x2aa   : > { %v2372_v36 = vadd.f32 %v2370_v32, %v2368_v29 }
 0x2ab   : > { %v2371_v37 = vadd.f32 %v2369_v35, %v2367_v33 }
 0x2d2   : > { %v13587_v40 = vpop.f32.mrb[4].mxu0 }
 0x2d3   : > { %v3378_v41 = vmul.f32 %v13587_v40, %v13587_v40  ;;  %v13629_v43 = vpop.f32.mrb[4].mxu1  ;;  %v2865_v44 = vpop.f32.mrb[5].mxu0 }
 0x2d4   : > { %v3380_v45 = vmul.f32 %v13629_v43, %v13629_v43  ;;  %v3377_v46 = vmul.f32 %v2865_v44, %v2865_v44  ;;  %v3367_v51 = vpop.f32.mrb[5].mxu1 }
 0x2d5   : > { %v3379_v52 = vmul.f32 %v3367_v51, %v3367_v51 }
 0x2d6   : > { %v3382_v53 = vadd.f32 %v3380_v45, %v3378_v41  ;;  %v12779_v41 = vld [vmem:[%s15783_s17 + $0x28] sm:$0xff] }
 0x2d7   : > { %v3381_v54 = vadd.f32 %v3379_v52, %v3377_v46  ;;  %v6966_v46 = vand.u32 4294901760, %v12779_v41 }
 0x2d9   : > { %vm3383_vm1 = vcmp.gt.f32.partialorder %v3381_v54, %v2371_v37 }
 0x2da   : > { %v3384_v55 = vsel %vm3383_vm1, %v2865_v44, %v1849_v31  ;;  %v3385_v56 = vsel %vm3383_vm1, %v3367_v51, %v2357_v34  ;;  %v3386_v57 = vsel %vm3383_vm1, %v3381_v54, %v2371_v37  ;;  %v12777_v37 = vld [vmem:[%s15776_s2 + $0x28] sm:$0xff]  ;;  %v7058_v54 = vsub.f32 %v12779_v41, %v6966_v46 }
 0x2db   : > { %vm3387_vm2 = vcmp.gt.f32.partialorder %v2372_v36, %v3386_v57  ;;  %v6464_v44 = vand.u32 4294901760, %v12777_v37 }
 0x2dc   : > { %v3388_v58 = vsel %vm3387_vm2, %v13503_v28, %v3384_v55  ;;  %v3389_v62 = vsel %vm3387_vm2, %v13545_v30, %v3385_v56  ;;  %v3390_v63 = vsel %vm3387_vm2, %v2372_v36, %v3386_v57  ;;  %v12776_v36 = vld [vmem:[%s15776_s2 + $0x20] sm:$0xff] }
 0x2dd   : > { %vm3391_vm4 = vcmp.gt.f32.partialorder %v3382_v53, %v3390_v63  ;;  %v6556_v52 = vsub.f32 %v12777_v37, %v6464_v44 }
 0x2de   : > { %v3392_v0 = vsel %vm3391_vm4, %v13587_v40, %v3388_v58  ;;  %v3393_v1 = vsel %vm3391_vm4, %v13629_v43, %v3389_v62  ;;  %v12778_v40 = vld [vmem:[%s15783_s17 + $0x20] sm:$0xff]  ;;  %v6461_v43 = vand.u32 4294901760, %v12776_v36  ;;  %v7059_v58 = vand.u32 4294901760, %v7058_v54 }
 0x2df   : > { %3395 = vst.msk [vmem:[%s16075_s9] sm:$0xff] %vm3394_vm3, %v3392_v0  ;;  %3396 = vst.msk [vmem:[%s16079_s8] sm:$0xff] %vm3394_vm3, %v3393_v1  ;;  %v6963_v45 = vand.u32 4294901760, %v12778_v40  ;;  %v6557_v56 = vand.u32 4294901760, %v6556_v52 }
 0x2e0   : > { %v16197_v51 = vsub.f32 %v12776_v36, %v6461_v43  ;;  %v16208_v62 = vpack.c.bf16 %v6464_v44, %v6461_v43 }
 0x2e1   : > { %v7051_v53 = vsub.f32 %v12778_v40, %v6963_v45  ;;  %v6558_v0 = vsub.f32 %v6556_v52, %v6557_v56  ;;  %v14698_v1 = vpack.c.bf16 %v6966_v46, %v6963_v45 }
 0x2e2   : > { %v6550_v55 = vand.u32 4294901760, %v16197_v51 }
 0x2e3   : > { %v7052_v57 = vand.u32 4294901760, %v7051_v53 }
 0x2e4   : > { %v6551_v63 = vsub.f32 %v16197_v51, %v6550_v55 }
 0x2fe   : > { %v13671_v3 = vpop.f32.mrb[6].mxu0 }
 0x2ff   : > { %v4411_v4 = vsel %vm340_vm0, %v13671_v3, 0  ;;  %v13713_v5 = vpop.f32.mrb[6].mxu1  ;;  %v3895_v8 = vpop.f32.mrb[7].mxu0  ;;  %v7053_v3 = vsub.f32 %v7051_v53, %v7052_v57 }
 0x300   : > { %v16084_v9 = vand.u32 4294901760, %v4411_v4  ;;  %v4919_v11 = vsel %vm340_vm0, %v13713_v5, 0  ;;  %v4408_v12 = vsel %vm340_vm0, %v3895_v8, 0  ;;  %v4397_v15 = vpop.f32.mrb[7].mxu1  ;;  %v6552_v5 = vand.u32 4294901760, %v6551_v63 }
 0x301   : > { %v16088_v16 = vand.u32 4294901760, %v4919_v11  ;;  %v16090_v17 = vand.u32 4294901760, %v4408_v12  ;;  %v4916_v18 = vsel %vm340_vm0, %v4397_v15, 0  ;;  %v6559_v8 = vand.u32 4294901760, %v6558_v0 }
 0x302   : > { %v16094_v19 = vsub.f32 %v4411_v4, %v16084_v9  ;;  %v16096_v22 = vand.u32 4294901760, %v4916_v18  ;;  %v7060_v4 = vsub.f32 %v7058_v54, %v7059_v58 }
 0x303   : > { %v16099_v23 = vsub.f32 %v4919_v11, %v16088_v16  ;;  %v16102_v24 = vsub.f32 %v4408_v12, %v16090_v17  ;;  %v7054_v11 = vand.u32 4294901760, %v7053_v3  ;;  %v14678_v15 = vpack.c.bf16 %v6559_v8, %v6552_v5 }
 0x304   : > { %v16105_v25 = vand.u32 4294901760, %v16094_v19  ;;  %v16108_v7 = vsub.f32 %v4916_v18, %v16096_v22  ;;  %v7061_v12 = vand.u32 4294901760, %v7060_v4 }
 0x305   : > { %v16111_v10 = vand.u32 4294901760, %v16099_v23  ;;  %v16114_v2 = vand.u32 4294901760, %v16102_v24 }
 0x306   : > { %v16117_v6 = vand.u32 4294901760, %v16108_v7  ;;  %v4493_v28 = vsub.f32 %v16094_v19, %v16105_v25  ;;  %v14702_v18 = vpack.c.bf16 %v7061_v12, %v7054_v11 }
 0x307   : > { %v4483_v29 = vsub.f32 %v16102_v24, %v16114_v2  ;;  %v5001_v30 = vsub.f32 %v16099_v23, %v16111_v10 }
 0x308   : > { %v4991_v31 = vsub.f32 %v16108_v7, %v16117_v6  ;;  %v4494_v34 = vand.u32 4294901760, %v4493_v28 }
 0x309   : > { %v4484_v32 = vand.u32 4294901760, %v4483_v29  ;;  %v5002_v35 = vand.u32 4294901760, %v5001_v30 }
 0x30a   : > { %v4992_v33 = vand.u32 4294901760, %v4991_v31 }
 0x30b   : > { %13718 = vmatprep.mubr.f32.mxu0 %v4484_v32 }
 0x30c   : > { %13760 = vmatprep.mubr.f32.mxu1 %v4992_v33  ;;  %13719 = vmatmul.mubr.f32.vlgmr.msra.gmra.mrb[8].mxu0 %v4494_v34 }
 0x30d   : > { %13761 = vmatmul.mubr.f32.vlgmr.msra.gmra.mrb[8].mxu1 %v5002_v35  ;;  %14585 = vmatpush3.bf16.msra.mxu0 %v15873_v59 }
 0x30e   : > { %13725 = vmatprep.mubr.f32.mxu0 %v16090_v17  ;;  %14609 = vmatpush3.bf16.msra.mxu1 %v15873_v59 }
 0x30f   : > { %13767 = vmatprep.mubr.f32.mxu1 %v16096_v22  ;;  %14587 = vmatprep.subr.bf16.mxu0 %v15877_v60 }
 0x310   : > { %14611 = vmatprep.subr.bf16.mxu1 %v15877_v60 }
 0x314   : > { %13726 = vmatmul.mubr.f32.vlgmr.msra.gmra.mrb[8].mxu0 %v16084_v9 }
 0x315   : > { %13768 = vmatmul.mubr.f32.vlgmr.msra.gmra.mrb[8].mxu1 %v16088_v16  ;;  %14589 = vmatpush3.bf16.msra.mxu0 %v15877_v60 }
 0x316   : > { %13732 = vmatprep.mubr.f32.mxu0 %v16102_v24  ;;  %14613 = vmatpush3.bf16.msra.mxu1 %v15877_v60 }
 0x317   : > { %13774 = vmatprep.mubr.f32.mxu1 %v16108_v7  ;;  %14591 = vmatprep.subr.bf16.mxu0 %v15867_v50 }
 0x318   : > { %14615 = vmatprep.subr.bf16.mxu1 %v15867_v50 }
 0x31c   : > { %13733 = vmatmul.mubr.f32.vlgmr.msra.gmra.mrb[8].mxu0 %v16094_v19 }
 0x31d   : > { %13775 = vmatmul.mubr.f32.vlgmr.msra.gmra.mrb[8].mxu1 %v16099_v23  ;;  %14593 = vmatpush3.bf16.msra.mxu0 %v15867_v50 }
 0x31e   : > { %13739 = vmatprep.mubr.f32.mxu0 %v16114_v2  ;;  %14617 = vmatpush3.bf16.msra.mxu1 %v15867_v50 }
 0x31f   : > { %13781 = vmatprep.mubr.f32.mxu1 %v16117_v6  ;;  %14595 = vmatprep.subr.bf16.mxu0 %v15879_v61 }
 0x320   : > { %14619 = vmatprep.subr.bf16.mxu1 %v15879_v61 }
 0x324   : > { %13740 = vmatmul.mubr.f32.vlgmr.msra.gmra.mrb[8].mxu0 %v16105_v25 }
 0x325   : > { %13782 = vmatmul.mubr.f32.vlgmr.msra.gmra.mrb[8].mxu1 %v16111_v10  ;;  %14597 = vmatpush3.bf16.msra.mxu0 %v15879_v61 }
 0x326   : > { %13746 = vmatprep.mubr.f32.mxu0 %v16090_v17  ;;  %14621 = vmatpush3.bf16.msra.mxu1 %v15879_v61 }
 0x327   : > { %13788 = vmatprep.mubr.f32.mxu1 %v16096_v22  ;;  %14599 = vmatprep.subr.bf16.mxu0 %v15867_v50 }
 0x328   : > { %14623 = vmatprep.subr.bf16.mxu1 %v15867_v50 }
 0x32c   : > { %13747 = vmatmul.mubr.f32.vlgmr.msra.gmra.mrb[8].mxu0 %v16084_v9 }
 0x32d   : > { %13789 = vmatmul.mubr.f32.vlgmr.msra.gmra.mrb[8].mxu1 %v16088_v16  ;;  %14601 = vmatpush3.bf16.msra.mxu0 %v15867_v50 }
 0x32e   : > { %13753 = vmatprep.mubr.f32.mxu0 %v16090_v17  ;;  %14625 = vmatpush3.bf16.msra.mxu1 %v15867_v50 }
 0x32f   : > { %13795 = vmatprep.mubr.f32.mxu1 %v16096_v22  ;;  %14627 = vmatprep.subr.bf16.mxu0 %v15964_v42 }
 0x330   : > { %14651 = vmatprep.subr.bf16.mxu1 %v15964_v42 }
 0x334   : > { %13754 = vmatmul.mubr.f32.vlgmr.msra.gmra.mrb[8].mxu0 %v16084_v9 }
 0x335   : > { %13796 = vmatmul.mubr.f32.vlgmr.msra.gmra.mrb[8].mxu1 %v16088_v16  ;;  %14629 = vmatpush3.bf16.msra.mxu0 %v15964_v42 }
 0x336   : > { %13802 = vmatprep.mubr.f32.mxu0 %v4484_v32  ;;  %14653 = vmatpush3.bf16.msra.mxu1 %v15964_v42 }
 0x337   : > { %13844 = vmatprep.mubr.f32.mxu1 %v4992_v33  ;;  %14631 = vmatprep.subr.bf16.mxu0 %v15974_v47 }
 0x338   : > { %13803 = vmatmul.mubr.f32.vlgmr.msra.gmra.mrb[10].mxu0 %v4494_v34  ;;  %14655 = vmatprep.subr.bf16.mxu1 %v15974_v47 }
 0x339   : > { %13845 = vmatmul.mubr.f32.vlgmr.msra.gmra.mrb[10].mxu1 %v5002_v35  ;;  %14633 = vmatpush3.bf16.msra.mxu0 %v15974_v47 }
 0x33a   : > { %13809 = vmatprep.mubr.f32.mxu0 %v16090_v17  ;;  %14657 = vmatpush3.bf16.msra.mxu1 %v15974_v47 }
 0x33b   : > { %13851 = vmatprep.mubr.f32.mxu1 %v16096_v22  ;;  %14635 = vmatprep.subr.bf16.mxu0 %v15982_v48 }
 0x33c   : > { %14659 = vmatprep.subr.bf16.mxu1 %v15982_v48 }
 0x340   : > { %13810 = vmatmul.mubr.f32.vlgmr.msra.gmra.mrb[10].mxu0 %v16084_v9 }
 0x341   : > { %13852 = vmatmul.mubr.f32.vlgmr.msra.gmra.mrb[10].mxu1 %v16088_v16  ;;  %14637 = vmatpush3.bf16.msra.mxu0 %v15982_v48 }
 0x342   : > { %13816 = vmatprep.mubr.f32.mxu0 %v16102_v24  ;;  %14661 = vmatpush3.bf16.msra.mxu1 %v15982_v48 }
 0x343   : > { %13858 = vmatprep.mubr.f32.mxu1 %v16108_v7  ;;  %14639 = vmatprep.subr.bf16.mxu0 %v15964_v42 }
 0x344   : > { %14663 = vmatprep.subr.bf16.mxu1 %v15964_v42 }
 0x348   : > { %13817 = vmatmul.mubr.f32.vlgmr.msra.gmra.mrb[10].mxu0 %v16094_v19  ;;  %v14706_v19 = vpack.c.bf16 %v7058_v54, %v7051_v53 }
 0x349   : > { %13859 = vmatmul.mubr.f32.vlgmr.msra.gmra.mrb[10].mxu1 %v16099_v23  ;;  %14641 = vmatpush3.bf16.msra.mxu0 %v15964_v42 }
 0x34a   : > { %13823 = vmatprep.mubr.f32.mxu0 %v16114_v2  ;;  %14665 = vmatpush3.bf16.msra.mxu1 %v15964_v42 }
 0x34b   : > { %13865 = vmatprep.mubr.f32.mxu1 %v16117_v6  ;;  %14643 = vmatprep.subr.bf16.mxu0 %v16001_v49 }
 0x34c   : > { %14667 = vmatprep.subr.bf16.mxu1 %v16001_v49 }
 0x350   : > { %13824 = vmatmul.mubr.f32.vlgmr.msra.gmra.mrb[10].mxu0 %v16105_v25 }
 0x351   : > { %13866 = vmatmul.mubr.f32.vlgmr.msra.gmra.mrb[10].mxu1 %v16111_v10  ;;  %14645 = vmatpush3.bf16.msra.mxu0 %v16001_v49 }
 0x352   : > { %13830 = vmatprep.mubr.f32.mxu0 %v16090_v17  ;;  %14669 = vmatpush3.bf16.msra.mxu1 %v16001_v49 }
 0x353   : > { %13872 = vmatprep.mubr.f32.mxu1 %v16096_v22  ;;  %14647 = vmatprep.subr.bf16.mxu0 %v15964_v42 }
 0x354   : > { %14671 = vmatprep.subr.bf16.mxu1 %v15964_v42 }
 0x358   : > { %13831 = vmatmul.mubr.f32.vlgmr.msra.gmra.mrb[10].mxu0 %v16084_v9 }
 0x359   : > { %13873 = vmatmul.mubr.f32.vlgmr.msra.gmra.mrb[10].mxu1 %v16088_v16  ;;  %14649 = vmatpush3.bf16.msra.mxu0 %v15964_v42 }
 0x35a   : > { %13837 = vmatprep.mubr.f32.mxu0 %v16090_v17  ;;  %14673 = vmatpush3.bf16.msra.mxu1 %v15964_v42  ;;  %v14682_v17 = vpack.c.bf16 %v6556_v52, %v16197_v51 }
 0x35b   : > { %13879 = vmatprep.mubr.f32.mxu1 %v16096_v22  ;;  %14675 = vmatprep.subr.bf16.mxu0 %v16208_v62 }
 0x35c   : > { %14699 = vmatprep.subr.bf16.mxu1 %v14698_v1 }
 0x360   : > { %13838 = vmatmul.mubr.f32.vlgmr.msra.gmra.mrb[10].mxu0 %v16084_v9  ;;  %v14690_v9 = vpack.c.bf16 %v6557_v56, %v6550_v55 }
 0x361   : > { %13880 = vmatmul.mubr.f32.vlgmr.msra.gmra.mrb[10].mxu1 %v16088_v16  ;;  %14677 = vmatpush3.bf16.msra.mxu0 %v16208_v62  ;;  %v14714_v16 = vpack.c.bf16 %v7059_v58, %v7052_v57 }
 0x362   : > { %14701 = vmatpush3.bf16.msra.mxu1 %v14698_v1  ;;  %13886 = vmatprep.mubr.f32.mxu0 %v15831_v38 }
 0x363   : > { %13928 = vmatprep.mubr.f32.mxu1 %v15831_v38  ;;  %14679 = vmatprep.subr.bf16.mxu0 %v14678_v15 }
 0x364   : > { %13887 = vmatmul.mubr.f32.vlgmr.msra.gmra.mrb[12].mxu0 %v15833_v39  ;;  %14703 = vmatprep.subr.bf16.mxu1 %v14702_v18 }
 0x365   : > { %13929 = vmatmul.mubr.f32.vlgmr.msra.gmra.mrb[12].mxu1 %v15833_v39  ;;  %14681 = vmatpush3.bf16.msra.mxu0 %v14678_v15 }
 0x366   : > { %14705 = vmatpush3.bf16.msra.mxu1 %v14702_v18  ;;  %13893 = vmatprep.mubr.f32.mxu0 %v15805_v13 }
 0x367   : > { %13935 = vmatprep.mubr.f32.mxu1 %v15805_v13  ;;  %14683 = vmatprep.subr.bf16.mxu0 %v14682_v17 }
 0x368   : > { %14707 = vmatprep.subr.bf16.mxu1 %v14706_v19 }
 0x36c   : > { %13894 = vmatmul.mubr.f32.vlgmr.msra.gmra.mrb[12].mxu0 %v15807_v14 }
 0x36d   : > { %13936 = vmatmul.mubr.f32.vlgmr.msra.gmra.mrb[12].mxu1 %v15807_v14  ;;  %14685 = vmatpush3.bf16.msra.mxu0 %v14682_v17 }
 0x36e   : > { %14709 = vmatpush3.bf16.msra.mxu1 %v14706_v19  ;;  %13900 = vmatprep.mubr.f32.mxu0 %v15813_v20 }
 0x36f   : > { %13942 = vmatprep.mubr.f32.mxu1 %v15813_v20  ;;  %14687 = vmatprep.subr.bf16.mxu0 %v16208_v62 }
 0x370   : > { %14711 = vmatprep.subr.bf16.mxu1 %v14698_v1 }
 0x374   : > { %13901 = vmatmul.mubr.f32.vlgmr.msra.gmra.mrb[12].mxu0 %v15816_v21 }
 0x375   : > { %13943 = vmatmul.mubr.f32.vlgmr.msra.gmra.mrb[12].mxu1 %v15816_v21  ;;  %14689 = vmatpush3.bf16.msra.mxu0 %v16208_v62 }
 0x376   : > { %14713 = vmatpush3.bf16.msra.mxu1 %v14698_v1  ;;  %13907 = vmatprep.mubr.f32.mxu0 %v15822_v26 }
 0x377   : > { %13949 = vmatprep.mubr.f32.mxu1 %v15822_v26  ;;  %14691 = vmatprep.subr.bf16.mxu0 %v14690_v9 }
 0x378   : > { %14715 = vmatprep.subr.bf16.mxu1 %v14714_v16 }
 0x37c   : > { %13908 = vmatmul.mubr.f32.vlgmr.msra.gmra.mrb[12].mxu0 %v15825_v27 }
 0x37d   : > { %13950 = vmatmul.mubr.f32.vlgmr.msra.gmra.mrb[12].mxu1 %v15825_v27  ;;  %14693 = vmatpush3.bf16.msra.mxu0 %v14690_v9 }
 0x37e   : > { %14717 = vmatpush3.bf16.msra.mxu1 %v14714_v16  ;;  %13914 = vmatprep.mubr.f32.mxu0 %v15805_v13 }
 0x37f   : > { %13956 = vmatprep.mubr.f32.mxu1 %v15805_v13  ;;  %14695 = vmatprep.subr.bf16.mxu0 %v16208_v62 }
 0x380   : > { %14719 = vmatprep.subr.bf16.mxu1 %v14698_v1 }
 0x384   : > { %13915 = vmatmul.mubr.f32.vlgmr.msra.gmra.mrb[12].mxu0 %v15807_v14 }
 0x385   : > { %13957 = vmatmul.mubr.f32.vlgmr.msra.gmra.mrb[12].mxu1 %v15807_v14  ;;  %14697 = vmatpush3.bf16.msra.mxu0 %v16208_v62 }
 0x386   : > { %14721 = vmatpush3.bf16.msra.mxu1 %v14698_v1  ;;  %13921 = vmatprep.mubr.f32.mxu0 %v15805_v13 }
 0x387   : > { %13963 = vmatprep.mubr.f32.mxu1 %v15805_v13  ;;  %14723 = vmatprep.subr.bf16.mxu0 %v15867_v50 }
 0x388   : > { %14747 = vmatprep.subr.bf16.mxu1 %v15867_v50 }
 0x38c   : > { %13922 = vmatmul.mubr.f32.vlgmr.msra.gmra.mrb[12].mxu0 %v15807_v14 }
 0x38d   : > { %13964 = vmatmul.mubr.f32.vlgmr.msra.gmra.mrb[12].mxu1 %v15807_v14  ;;  %14725 = vmatpush3.bf16.msra.mxu0 %v15867_v50 }
 0x38e   : > { %14749 = vmatpush3.bf16.msra.mxu1 %v15867_v50  ;;  %14727 = vmatprep.subr.bf16.mxu0 %v15873_v59 }
 0x38f   : > { %14751 = vmatprep.subr.bf16.mxu1 %v15873_v59 }
 0x407   : > { %v13755_v22 = vpop.f32.mrb[8].mxu0 }
 0x408   : > { %v5424_v23 = vmul.f32 %v13755_v22, %v13755_v22  ;;  %v13797_v24 = vpop.f32.mrb[8].mxu1  ;;  %v4905_v25 = vpop.f32.mrb[9].mxu0 }
 0x409   : > { %v5426_v7 = vmul.f32 %v13797_v24, %v13797_v24  ;;  %v5423_v10 = vmul.f32 %v4905_v25, %v4905_v25  ;;  %v5413_v2 = vpop.f32.mrb[9].mxu1 }
 0x40a   : > { %v5425_v6 = vmul.f32 %v5413_v2, %v5413_v2 }
 0x40b   : > { %v5428_v28 = vadd.f32 %v5426_v7, %v5424_v23 }
 0x40c   : > { %v5427_v29 = vadd.f32 %v5425_v6, %v5423_v10 }
 0x433   : > { %v13839_v30 = vpop.f32.mrb[10].mxu0 }
 0x434   : > { %v6434_v31 = vmul.f32 %v13839_v30, %v13839_v30  ;;  %v13881_v32 = vpop.f32.mrb[10].mxu1  ;;  %v5921_v33 = vpop.f32.mrb[11].mxu0 }
 0x435   : > { %v6436_v34 = vmul.f32 %v13881_v32, %v13881_v32  ;;  %v6433_v35 = vmul.f32 %v5921_v33, %v5921_v33  ;;  %v6423_v36 = vpop.f32.mrb[11].mxu1 }
 0x436   : > { %v6435_v37 = vmul.f32 %v6423_v36, %v6423_v36 }
 0x437   : > { %v6438_v40 = vadd.f32 %v6436_v34, %v6434_v31  ;;  %v12785_v31 = vld [vmem:[%s15783_s17 + $0x38] sm:$0xff] }
 0x438   : > { %v6437_v41 = vadd.f32 %v6435_v37, %v6433_v35  ;;  %v10023_v35 = vand.u32 4294901760, %v12785_v31 }
 0x43a   : > { %vm6439_vm5 = vcmp.gt.f32.partialorder %v6437_v41, %v5427_v29 }
 0x43b   : > { %v6440_v43 = vsel %vm6439_vm5, %v5921_v33, %v4905_v25  ;;  %v6441_v44 = vsel %vm6439_vm5, %v6423_v36, %v5413_v2  ;;  %v6442_v45 = vsel %vm6439_vm5, %v6437_v41, %v5427_v29  ;;  %v12783_v29 = vld [vmem:[%s15776_s2 + $0x38] sm:$0xff]  ;;  %v10115_v41 = vsub.f32 %v12785_v31, %v10023_v35 }
 0x43c   : > { %vm6443_vm6 = vcmp.gt.f32.partialorder %v5428_v28, %v6442_v45  ;;  %v9521_v33 = vand.u32 4294901760, %v12783_v29 }
 0x43d   : > { %v6444_v46 = vsel %vm6443_vm6, %v13755_v22, %v6440_v43  ;;  %v6445_v51 = vsel %vm6443_vm6, %v13797_v24, %v6441_v44  ;;  %v6446_v52 = vsel %vm6443_vm6, %v5428_v28, %v6442_v45  ;;  %v12782_v28 = vld [vmem:[%s15776_s2 + $0x30] sm:$0xff]  ;;  %s15517_s2 = smov [#allocation10]  }
 0x43e   : > { %vm6447_vm7 = vcmp.gt.f32.partialorder %v6438_v40, %v6446_v52  ;;  %v9613_v37 = vsub.f32 %v12783_v29, %v9521_v33  ;;  %s15403_s12 = sshll.u32 %s15517_s2, 4  ;;  %s15404_s12 = int_to_ptr.vmem [resolvable:$false] %s15403_s12 }
 0x43f   : > { %v6448_v53 = vsel %vm6447_vm7, %v13839_v30, %v6444_v46  ;;  %v6449_v54 = vsel %vm6447_vm7, %v13881_v32, %v6445_v51  ;;  %v12784_v30 = vld [vmem:[%s15783_s17 + $0x30] sm:$0xff]  ;;  %v9518_v32 = vand.u32 4294901760, %v12782_v28  ;;  %v10116_v46 = vand.u32 4294901760, %v10115_v41  ;;  %s15405_s26 = scalar_lea.vmem %s15404_s12, 1024  ;;  %p15406_p4 = scmp.lt.s32.totalorder %s16573_s16, %s15404_s12 }
 0x440   : > { %12774 = vst.msk [vmem:[%s16075_s9 + $0x8] sm:$0xff] %vm3394_vm3, %v6448_v53  ;;  %12775 = vst.msk [vmem:[%s16079_s8 + $0x8] sm:$0xff] %vm3394_vm3, %v6449_v54  ;;  %v10020_v34 = vand.u32 4294901760, %v12784_v30  ;;  %v9614_v44 = vand.u32 4294901760, %v9613_v37  ;;  %p15407_p5 = scmp.lt.s32.totalorder %s15405_s26, %s15399_s30 }
 0x441   : > { %v16374_v36 = vsub.f32 %v12782_v28, %v9518_v32  ;;  %v16385_v51 = vpack.c.bf16 %v9521_v33, %v9518_v32 }
 0x442   : > { %v10108_v40 = vsub.f32 %v12784_v30, %v10020_v34  ;;  %v9615_v53 = vsub.f32 %v9613_v37, %v9614_v44  ;;  %v14842_v54 = vpack.c.bf16 %v10023_v35, %v10020_v34  ;;  %p15408_p3 = por %p15407_p5, %p15406_p4 }
 0x443   : > { %v9607_v43 = vand.u32 4294901760, %v16374_v36 }
 0x444   : > { %v10109_v45 = vand.u32 4294901760, %v10108_v40  ;;  %p15409_p7 = pnand %p15408_p3, %p15402_p10 }
 0x445   : > { %v9608_v52 = vsub.f32 %v16374_v36, %v9607_v43 }
 0x45f   : > { %v13923_v55 = vpop.f32.mrb[12].mxu0 }
 0x460   : > { %v7468_v56 = vsel %vm340_vm0, %v13923_v55, 0  ;;  %v13965_v57 = vpop.f32.mrb[12].mxu1  ;;  %v6952_v58 = vpop.f32.mrb[13].mxu0  ;;  %v10110_v55 = vsub.f32 %v10108_v40, %v10109_v45 }
 0x461   : > { %v16261_v62 = vand.u32 4294901760, %v7468_v56  ;;  %v7976_v63 = vsel %vm340_vm0, %v13965_v57, 0  ;;  %v7465_v0 = vsel %vm340_vm0, %v6952_v58, 0  ;;  %v7454_v1 = vpop.f32.mrb[13].mxu1  ;;  %v9609_v57 = vand.u32 4294901760, %v9608_v52 }
 0x462   : > { %v16265_v3 = vand.u32 4294901760, %v7976_v63  ;;  %v16267_v4 = vand.u32 4294901760, %v7465_v0  ;;  %v7973_v5 = vsel %vm340_vm0, %v7454_v1, 0  ;;  %v9616_v58 = vand.u32 4294901760, %v9615_v53 }
 0x463   : > { %v16271_v8 = vsub.f32 %v7468_v56, %v16261_v62  ;;  %v16273_v11 = vand.u32 4294901760, %v7973_v5  ;;  %v10117_v56 = vsub.f32 %v10115_v41, %v10116_v46 }
 0x464   : > { %v16276_v12 = vsub.f32 %v7976_v63, %v16265_v3  ;;  %v16279_v15 = vsub.f32 %v7465_v0, %v16267_v4  ;;  %v10111_v63 = vand.u32 4294901760, %v10110_v55  ;;  %v14822_v1 = vpack.c.bf16 %v9616_v58, %v9609_v57 }
 0x465   : > { %v16282_v18 = vand.u32 4294901760, %v16271_v8  ;;  %v16285_v17 = vsub.f32 %v7973_v5, %v16273_v11  ;;  %v10118_v0 = vand.u32 4294901760, %v10117_v56 }
 0x466   : > { %v16288_v19 = vand.u32 4294901760, %v16276_v12  ;;  %v16291_v9 = vand.u32 4294901760, %v16279_v15 }
 0x467   : > { %v16294_v16 = vand.u32 4294901760, %v16285_v17  ;;  %v7550_v22 = vsub.f32 %v16271_v8, %v16282_v18  ;;  %v14846_v5 = vpack.c.bf16 %v10118_v0, %v10111_v63 }
 0x468   : > { %v7540_v23 = vsub.f32 %v16279_v15, %v16291_v9  ;;  %v8058_v24 = vsub.f32 %v16276_v12, %v16288_v19 }
 0x469   : > { %v8048_v25 = vsub.f32 %v16285_v17, %v16294_v16  ;;  %v7551_v2 = vand.u32 4294901760, %v7550_v22 }
 0x46a   : > { %v7541_v7 = vand.u32 4294901760, %v7540_v23  ;;  %v8059_v6 = vand.u32 4294901760, %v8058_v24 }
 0x46b   : > { %v8049_v10 = vand.u32 4294901760, %v8048_v25 }
 0x46c   : > { %13970 = vmatprep.mubr.f32.mxu0 %v7541_v7 }
 0x46d   : > { %14012 = vmatprep.mubr.f32.mxu1 %v8049_v10  ;;  %13971 = vmatmul.mubr.f32.vlgmr.msra.gmra.mrb[14].mxu0 %v7551_v2 }
 0x46e   : > { %14013 = vmatmul.mubr.f32.vlgmr.msra.gmra.mrb[14].mxu1 %v8059_v6  ;;  %14729 = vmatpush3.bf16.msra.mxu0 %v15873_v59 }
 0x46f   : > { %13977 = vmatprep.mubr.f32.mxu0 %v16267_v4  ;;  %14753 = vmatpush3.bf16.msra.mxu1 %v15873_v59 }
 0x470   : > { %14019 = vmatprep.mubr.f32.mxu1 %v16273_v11  ;;  %14731 = vmatprep.subr.bf16.mxu0 %v15877_v60 }
 0x471   : > { %14755 = vmatprep.subr.bf16.mxu1 %v15877_v60 }
 0x475   : > { %13978 = vmatmul.mubr.f32.vlgmr.msra.gmra.mrb[14].mxu0 %v16261_v62 }
 0x476   : > { %14020 = vmatmul.mubr.f32.vlgmr.msra.gmra.mrb[14].mxu1 %v16265_v3  ;;  %14733 = vmatpush3.bf16.msra.mxu0 %v15877_v60 }
 0x477   : > { %13984 = vmatprep.mubr.f32.mxu0 %v16279_v15  ;;  %14757 = vmatpush3.bf16.msra.mxu1 %v15877_v60 }
 0x478   : > { %14026 = vmatprep.mubr.f32.mxu1 %v16285_v17  ;;  %14735 = vmatprep.subr.bf16.mxu0 %v15867_v50 }
 0x479   : > { %14759 = vmatprep.subr.bf16.mxu1 %v15867_v50 }
 0x47d   : > { %13985 = vmatmul.mubr.f32.vlgmr.msra.gmra.mrb[14].mxu0 %v16271_v8 }
 0x47e   : > { %14027 = vmatmul.mubr.f32.vlgmr.msra.gmra.mrb[14].mxu1 %v16276_v12  ;;  %14737 = vmatpush3.bf16.msra.mxu0 %v15867_v50 }
 0x47f   : > { %13991 = vmatprep.mubr.f32.mxu0 %v16291_v9  ;;  %14761 = vmatpush3.bf16.msra.mxu1 %v15867_v50 }
 0x480   : > { %14033 = vmatprep.mubr.f32.mxu1 %v16294_v16  ;;  %14739 = vmatprep.subr.bf16.mxu0 %v15879_v61 }
 0x481   : > { %14763 = vmatprep.subr.bf16.mxu1 %v15879_v61 }
 0x485   : > { %13992 = vmatmul.mubr.f32.vlgmr.msra.gmra.mrb[14].mxu0 %v16282_v18 }
 0x486   : > { %14034 = vmatmul.mubr.f32.vlgmr.msra.gmra.mrb[14].mxu1 %v16288_v19  ;;  %14741 = vmatpush3.bf16.msra.mxu0 %v15879_v61 }
 0x487   : > { %13998 = vmatprep.mubr.f32.mxu0 %v16267_v4  ;;  %14765 = vmatpush3.bf16.msra.mxu1 %v15879_v61 }
 0x488   : > { %14040 = vmatprep.mubr.f32.mxu1 %v16273_v11  ;;  %14743 = vmatprep.subr.bf16.mxu0 %v15867_v50 }
 0x489   : > { %14767 = vmatprep.subr.bf16.mxu1 %v15867_v50 }
 0x48d   : > { %13999 = vmatmul.mubr.f32.vlgmr.msra.gmra.mrb[14].mxu0 %v16261_v62 }
 0x48e   : > { %14041 = vmatmul.mubr.f32.vlgmr.msra.gmra.mrb[14].mxu1 %v16265_v3  ;;  %14745 = vmatpush3.bf16.msra.mxu0 %v15867_v50 }
 0x48f   : > { %14005 = vmatprep.mubr.f32.mxu0 %v16267_v4  ;;  %14769 = vmatpush3.bf16.msra.mxu1 %v15867_v50 }
 0x490   : > { %14047 = vmatprep.mubr.f32.mxu1 %v16273_v11  ;;  %14771 = vmatprep.subr.bf16.mxu0 %v15964_v42 }
 0x491   : > { %14795 = vmatprep.subr.bf16.mxu1 %v15964_v42 }
 0x495   : > { %14006 = vmatmul.mubr.f32.vlgmr.msra.gmra.mrb[14].mxu0 %v16261_v62 }
 0x496   : > { %14048 = vmatmul.mubr.f32.vlgmr.msra.gmra.mrb[14].mxu1 %v16265_v3  ;;  %14773 = vmatpush3.bf16.msra.mxu0 %v15964_v42 }
 0x497   : > { %14054 = vmatprep.mubr.f32.mxu0 %v7541_v7  ;;  %14797 = vmatpush3.bf16.msra.mxu1 %v15964_v42 }
 0x498   : > { %14096 = vmatprep.mubr.f32.mxu1 %v8049_v10  ;;  %14775 = vmatprep.subr.bf16.mxu0 %v15974_v47 }
 0x499   : > { %14055 = vmatmul.mubr.f32.vlgmr.msra.gmra.mrb[16].mxu0 %v7551_v2  ;;  %14799 = vmatprep.subr.bf16.mxu1 %v15974_v47 }
 0x49a   : > { %14097 = vmatmul.mubr.f32.vlgmr.msra.gmra.mrb[16].mxu1 %v8059_v6  ;;  %14777 = vmatpush3.bf16.msra.mxu0 %v15974_v47 }
 0x49b   : > { %14061 = vmatprep.mubr.f32.mxu0 %v16267_v4  ;;  %14801 = vmatpush3.bf16.msra.mxu1 %v15974_v47 }
 0x49c   : > { %14103 = vmatprep.mubr.f32.mxu1 %v16273_v11  ;;  %14779 = vmatprep.subr.bf16.mxu0 %v15982_v48 }
 0x49d   : > { %14803 = vmatprep.subr.bf16.mxu1 %v15982_v48 }
 0x4a1   : > { %14062 = vmatmul.mubr.f32.vlgmr.msra.gmra.mrb[16].mxu0 %v16261_v62 }
 0x4a2   : > { %14104 = vmatmul.mubr.f32.vlgmr.msra.gmra.mrb[16].mxu1 %v16265_v3  ;;  %14781 = vmatpush3.bf16.msra.mxu0 %v15982_v48 }
 0x4a3   : > { %14068 = vmatprep.mubr.f32.mxu0 %v16279_v15  ;;  %14805 = vmatpush3.bf16.msra.mxu1 %v15982_v48 }
 0x4a4   : > { %14110 = vmatprep.mubr.f32.mxu1 %v16285_v17  ;;  %14783 = vmatprep.subr.bf16.mxu0 %v15964_v42 }
 0x4a5   : > { %14807 = vmatprep.subr.bf16.mxu1 %v15964_v42 }
 0x4a9   : > { %14069 = vmatmul.mubr.f32.vlgmr.msra.gmra.mrb[16].mxu0 %v16271_v8  ;;  %v14850_v8 = vpack.c.bf16 %v10115_v41, %v10108_v40 }
 0x4aa   : > { %14111 = vmatmul.mubr.f32.vlgmr.msra.gmra.mrb[16].mxu1 %v16276_v12  ;;  %14785 = vmatpush3.bf16.msra.mxu0 %v15964_v42 }
 0x4ab   : > { %14075 = vmatprep.mubr.f32.mxu0 %v16291_v9  ;;  %14809 = vmatpush3.bf16.msra.mxu1 %v15964_v42 }
 0x4ac   : > { %14117 = vmatprep.mubr.f32.mxu1 %v16294_v16  ;;  %14787 = vmatprep.subr.bf16.mxu0 %v16001_v49 }
 0x4ad   : > { %14811 = vmatprep.subr.bf16.mxu1 %v16001_v49 }
 0x4b1   : > { %14076 = vmatmul.mubr.f32.vlgmr.msra.gmra.mrb[16].mxu0 %v16282_v18 }
 0x4b2   : > { %14118 = vmatmul.mubr.f32.vlgmr.msra.gmra.mrb[16].mxu1 %v16288_v19  ;;  %14789 = vmatpush3.bf16.msra.mxu0 %v16001_v49 }
 0x4b3   : > { %14082 = vmatprep.mubr.f32.mxu0 %v16267_v4  ;;  %14813 = vmatpush3.bf16.msra.mxu1 %v16001_v49 }
 0x4b4   : > { %14124 = vmatprep.mubr.f32.mxu1 %v16273_v11  ;;  %14791 = vmatprep.subr.bf16.mxu0 %v15964_v42 }
 0x4b5   : > { %14815 = vmatprep.subr.bf16.mxu1 %v15964_v42 }
 0x4b9   : > { %14083 = vmatmul.mubr.f32.vlgmr.msra.gmra.mrb[16].mxu0 %v16261_v62 }
 0x4ba   : > { %14125 = vmatmul.mubr.f32.vlgmr.msra.gmra.mrb[16].mxu1 %v16265_v3  ;;  %14793 = vmatpush3.bf16.msra.mxu0 %v15964_v42 }
 0x4bb   : > { %14089 = vmatprep.mubr.f32.mxu0 %v16267_v4  ;;  %14817 = vmatpush3.bf16.msra.mxu1 %v15964_v42  ;;  %v14826_v4 = vpack.c.bf16 %v9613_v37, %v16374_v36 }
 0x4bc   : > { %14131 = vmatprep.mubr.f32.mxu1 %v16273_v11  ;;  %14819 = vmatprep.subr.bf16.mxu0 %v16385_v51 }
 0x4bd   : > { %14843 = vmatprep.subr.bf16.mxu1 %v14842_v54 }
 0x4c1   : > { %14090 = vmatmul.mubr.f32.vlgmr.msra.gmra.mrb[16].mxu0 %v16261_v62 }
 0x4c2   : > { %14132 = vmatmul.mubr.f32.vlgmr.msra.gmra.mrb[16].mxu1 %v16265_v3  ;;  %14821 = vmatpush3.bf16.msra.mxu0 %v16385_v51 }
 0x4c3   : > { %14845 = vmatpush3.bf16.msra.mxu1 %v14842_v54  ;;  %14138 = vmatprep.mubr.f32.mxu0 %v15831_v38 }
 0x4c4   : > { %14180 = vmatprep.mubr.f32.mxu1 %v15831_v38  ;;  %14823 = vmatprep.subr.bf16.mxu0 %v14822_v1  ;;  %v14834_v38 = vpack.c.bf16 %v9614_v44, %v9607_v43 }
 0x4c5   : > { %14139 = vmatmul.mubr.f32.vlgmr.msra.gmra.mrb[18].mxu0 %v15833_v39  ;;  %14847 = vmatprep.subr.bf16.mxu1 %v14846_v5 }
 0x4c6   : > { %14181 = vmatmul.mubr.f32.vlgmr.msra.gmra.mrb[18].mxu1 %v15833_v39  ;;  %14825 = vmatpush3.bf16.msra.mxu0 %v14822_v1  ;;  %v14858_v39 = vpack.c.bf16 %v10116_v46, %v10109_v45 }
 0x4c7   : > { %14849 = vmatpush3.bf16.msra.mxu1 %v14846_v5  ;;  %14145 = vmatprep.mubr.f32.mxu0 %v15805_v13 }
 0x4c8   : > { %14187 = vmatprep.mubr.f32.mxu1 %v15805_v13  ;;  %14827 = vmatprep.subr.bf16.mxu0 %v14826_v4 }
 0x4c9   : > { %14851 = vmatprep.subr.bf16.mxu1 %v14850_v8 }
 0x4cd   : > { %14146 = vmatmul.mubr.f32.vlgmr.msra.gmra.mrb[18].mxu0 %v15807_v14 }
 0x4ce   : > { %14188 = vmatmul.mubr.f32.vlgmr.msra.gmra.mrb[18].mxu1 %v15807_v14  ;;  %14829 = vmatpush3.bf16.msra.mxu0 %v14826_v4 }
 0x4cf   : > { %14853 = vmatpush3.bf16.msra.mxu1 %v14850_v8  ;;  %14152 = vmatprep.mubr.f32.mxu0 %v15813_v20 }
 0x4d0   : > { %14194 = vmatprep.mubr.f32.mxu1 %v15813_v20  ;;  %14831 = vmatprep.subr.bf16.mxu0 %v16385_v51 }
 0x4d1   : > { %14855 = vmatprep.subr.bf16.mxu1 %v14842_v54 }
 0x4d5   : > { %14153 = vmatmul.mubr.f32.vlgmr.msra.gmra.mrb[18].mxu0 %v15816_v21 }
 0x4d6   : > { %14195 = vmatmul.mubr.f32.vlgmr.msra.gmra.mrb[18].mxu1 %v15816_v21  ;;  %14833 = vmatpush3.bf16.msra.mxu0 %v16385_v51 }
 0x4d7   : > { %14857 = vmatpush3.bf16.msra.mxu1 %v14842_v54  ;;  %14159 = vmatprep.mubr.f32.mxu0 %v15822_v26 }
 0x4d8   : > { %14201 = vmatprep.mubr.f32.mxu1 %v15822_v26  ;;  %14835 = vmatprep.subr.bf16.mxu0 %v14834_v38 }
 0x4d9   : > { %14859 = vmatprep.subr.bf16.mxu1 %v14858_v39 }
 0x4dd   : > { %14160 = vmatmul.mubr.f32.vlgmr.msra.gmra.mrb[18].mxu0 %v15825_v27 }
 0x4de   : > { %14202 = vmatmul.mubr.f32.vlgmr.msra.gmra.mrb[18].mxu1 %v15825_v27  ;;  %14837 = vmatpush3.bf16.msra.mxu0 %v14834_v38 }
 0x4df   : > { %14861 = vmatpush3.bf16.msra.mxu1 %v14858_v39  ;;  %14166 = vmatprep.mubr.f32.mxu0 %v15805_v13 }
 0x4e0   : > { %14208 = vmatprep.mubr.f32.mxu1 %v15805_v13  ;;  %14839 = vmatprep.subr.bf16.mxu0 %v16385_v51 }
 0x4e1   : > { %14863 = vmatprep.subr.bf16.mxu1 %v14842_v54 }
 0x4e5   : > { %14167 = vmatmul.mubr.f32.vlgmr.msra.gmra.mrb[18].mxu0 %v15807_v14 }
 0x4e6   : > { %14209 = vmatmul.mubr.f32.vlgmr.msra.gmra.mrb[18].mxu1 %v15807_v14  ;;  %14841 = vmatpush3.bf16.msra.mxu0 %v16385_v51 }
 0x4e7   : > { %14865 = vmatpush3.bf16.msra.mxu1 %v14842_v54  ;;  %14173 = vmatprep.mubr.f32.mxu0 %v15805_v13 }
 0x4e8   : > { %14215 = vmatprep.mubr.f32.mxu1 %v15805_v13  ;;  %14867 = vmatprep.subr.bf16.mxu0 %v15867_v50 }
 0x4e9   : > { %14891 = vmatprep.subr.bf16.mxu1 %v15867_v50 }
 0x4ed   : > { %14174 = vmatmul.mubr.f32.vlgmr.msra.gmra.mrb[18].mxu0 %v15807_v14 }
 0x4ee   : > { %14216 = vmatmul.mubr.f32.vlgmr.msra.gmra.mrb[18].mxu1 %v15807_v14  ;;  %14869 = vmatpush3.bf16.msra.mxu0 %v15867_v50 }
 0x4ef   : > { %14893 = vmatpush3.bf16.msra.mxu1 %v15867_v50  ;;  %14871 = vmatprep.subr.bf16.mxu0 %v15873_v59 }
 0x4f0   : > { %14895 = vmatprep.subr.bf16.mxu1 %v15873_v59 }
 0x568   : > { %v14007_v20 = vpop.f32.mrb[14].mxu0 }
 0x569   : > { %v8481_v21 = vmul.f32 %v14007_v20, %v14007_v20  ;;  %v14049_v26 = vpop.f32.mrb[14].mxu1  ;;  %v7962_v13 = vpop.f32.mrb[15].mxu0 }
 0x56a   : > { %v8483_v27 = vmul.f32 %v14049_v26, %v14049_v26  ;;  %v8480_v62 = vmul.f32 %v7962_v13, %v7962_v13  ;;  %v8470_v3 = vpop.f32.mrb[15].mxu1 }
 0x56b   : > { %v8482_v11 = vmul.f32 %v8470_v3, %v8470_v3 }
 0x56c   : > { %v8485_v12 = vadd.f32 %v8483_v27, %v8481_v21 }
 0x56d   : > { %v8484_v15 = vadd.f32 %v8482_v11, %v8480_v62 }
 0x594   : > { %v14091_v18 = vpop.f32.mrb[16].mxu0 }
 0x595   : > { %v9491_v14 = vmul.f32 %v14091_v18, %v14091_v18  ;;  %v14133_v17 = vpop.f32.mrb[16].mxu1  ;;  %v8978_v19 = vpop.f32.mrb[17].mxu0 }
 0x596   : > { %v9493_v9 = vmul.f32 %v14133_v17, %v14133_v17  ;;  %v9490_v16 = vmul.f32 %v8978_v19, %v8978_v19  ;;  %v9480_v22 = vpop.f32.mrb[17].mxu1 }
 0x597   : > { %v9492_v23 = vmul.f32 %v9480_v22, %v9480_v22 }
 0x598   : > { %v9495_v24 = vadd.f32 %v9493_v9, %v9491_v14 }
 0x599   : > { %v9494_v25 = vadd.f32 %v9492_v23, %v9490_v16 }
 0x59b   : > { %vm9496_vm8 = vcmp.gt.f32.partialorder %v9494_v25, %v8484_v15 }
 0x59c   : > { %v9497_v7 = vsel %vm9496_vm8, %v8978_v19, %v7962_v13  ;;  %v9498_v10 = vsel %vm9496_vm8, %v9480_v22, %v8470_v3  ;;  %v9499_v2 = vsel %vm9496_vm8, %v9494_v25, %v8484_v15 }
 0x59d   : > { %vm9500_vm9 = vcmp.gt.f32.partialorder %v8485_v12, %v9499_v2 }
 0x59e   : > { %v9501_v6 = vsel %vm9500_vm9, %v14007_v20, %v9497_v7  ;;  %v9502_v28 = vsel %vm9500_vm9, %v14049_v26, %v9498_v10  ;;  %v9503_v29 = vsel %vm9500_vm9, %v8485_v12, %v9499_v2 }
 0x59f   : > { %vm9504_vm10 = vcmp.gt.f32.partialorder %v9495_v24, %v9503_v29 }
 0x5a0   : > { %v9505_v30 = vsel %vm9504_vm10, %v14091_v18, %v9501_v6  ;;  %v9506_v31 = vsel %vm9504_vm10, %v14133_v17, %v9502_v28 }
 0x5a1   : > { %12780 = vst.msk [vmem:[%s16075_s9 + $0x10] sm:$0xff] %vm3394_vm3, %v9505_v30  ;;  %12781 = vst.msk [vmem:[%s16079_s8 + $0x10] sm:$0xff] %vm3394_vm3, %v9506_v31 }
 0x5c0   : > { %v14175_v32 = vpop.f32.mrb[18].mxu0 }
 0x5c1   : > { %v10525_v33 = vsel %vm340_vm0, %v14175_v32, 0  ;;  %v14217_v34 = vpop.f32.mrb[18].mxu1  ;;  %v10009_v35 = vpop.f32.mrb[19].mxu0 }
 0x5c2   : > { %v16438_v36 = vand.u32 4294901760, %v10525_v33  ;;  %v11033_v37 = vsel %vm340_vm0, %v14217_v34, 0  ;;  %v10522_v40 = vsel %vm340_vm0, %v10009_v35, 0  ;;  %v10511_v41 = vpop.f32.mrb[19].mxu1 }
 0x5c3   : > { %v16442_v43 = vand.u32 4294901760, %v11033_v37  ;;  %v16444_v44 = vand.u32 4294901760, %v10522_v40  ;;  %v11030_v45 = vsel %vm340_vm0, %v10511_v41, 0 }
 0x5c4   : > { %v16448_v46 = vsub.f32 %v10525_v33, %v16438_v36  ;;  %v16450_v51 = vand.u32 4294901760, %v11030_v45 }
 0x5c5   : > { %v16453_v52 = vsub.f32 %v11033_v37, %v16442_v43  ;;  %v16456_v53 = vsub.f32 %v10522_v40, %v16444_v44 }
 0x5c6   : > { %v16459_v54 = vand.u32 4294901760, %v16448_v46  ;;  %v16462_v55 = vsub.f32 %v11030_v45, %v16450_v51 }
 0x5c7   : > { %v16465_v56 = vand.u32 4294901760, %v16453_v52  ;;  %v16468_v57 = vand.u32 4294901760, %v16456_v53 }
 0x5c8   : > { %v16471_v58 = vand.u32 4294901760, %v16462_v55  ;;  %v10607_v63 = vsub.f32 %v16448_v46, %v16459_v54 }
 0x5c9   : > { %v10597_v0 = vsub.f32 %v16456_v53, %v16468_v57  ;;  %v11115_v1 = vsub.f32 %v16453_v52, %v16465_v56 }
 0x5ca   : > { %v11105_v5 = vsub.f32 %v16462_v55, %v16471_v58  ;;  %v10608_v38 = vand.u32 4294901760, %v10607_v63 }
 0x5cb   : > { %v10598_v4 = vand.u32 4294901760, %v10597_v0  ;;  %v11116_v39 = vand.u32 4294901760, %v11115_v1 }
 0x5cc   : > { %v11106_v8 = vand.u32 4294901760, %v11105_v5 }
 0x5cd   : > { %14222 = vmatprep.mubr.f32.mxu0 %v10598_v4 }
 0x5ce   : > { %14264 = vmatprep.mubr.f32.mxu1 %v11106_v8  ;;  %14223 = vmatmul.mubr.f32.vlgmr.msra.gmra.mrb[20].mxu0 %v10608_v38 }
 0x5cf   : > { %14265 = vmatmul.mubr.f32.vlgmr.msra.gmra.mrb[20].mxu1 %v11116_v39  ;;  %14873 = vmatpush3.bf16.msra.mxu0 %v15873_v59 }
 0x5d0   : > { %14229 = vmatprep.mubr.f32.mxu0 %v16444_v44  ;;  %14897 = vmatpush3.bf16.msra.mxu1 %v15873_v59 }
 0x5d1   : > { %14271 = vmatprep.mubr.f32.mxu1 %v16450_v51  ;;  %14875 = vmatprep.subr.bf16.mxu0 %v15877_v60 }
 0x5d2   : > { %14899 = vmatprep.subr.bf16.mxu1 %v15877_v60 }
 0x5d6   : > { %14230 = vmatmul.mubr.f32.vlgmr.msra.gmra.mrb[20].mxu0 %v16438_v36 }
 0x5d7   : > { %14272 = vmatmul.mubr.f32.vlgmr.msra.gmra.mrb[20].mxu1 %v16442_v43  ;;  %14877 = vmatpush3.bf16.msra.mxu0 %v15877_v60 }
 0x5d8   : > { %14236 = vmatprep.mubr.f32.mxu0 %v16456_v53  ;;  %14901 = vmatpush3.bf16.msra.mxu1 %v15877_v60 }
 0x5d9   : > { %14278 = vmatprep.mubr.f32.mxu1 %v16462_v55  ;;  %14879 = vmatprep.subr.bf16.mxu0 %v15867_v50 }
 0x5da   : > { %14903 = vmatprep.subr.bf16.mxu1 %v15867_v50 }
 0x5de   : > { %14237 = vmatmul.mubr.f32.vlgmr.msra.gmra.mrb[20].mxu0 %v16448_v46 }
 0x5df   : > { %14279 = vmatmul.mubr.f32.vlgmr.msra.gmra.mrb[20].mxu1 %v16453_v52  ;;  %14881 = vmatpush3.bf16.msra.mxu0 %v15867_v50 }
 0x5e0   : > { %14243 = vmatprep.mubr.f32.mxu0 %v16468_v57  ;;  %14905 = vmatpush3.bf16.msra.mxu1 %v15867_v50 }
 0x5e1   : > { %14285 = vmatprep.mubr.f32.mxu1 %v16471_v58  ;;  %14883 = vmatprep.subr.bf16.mxu0 %v15879_v61 }
 0x5e2   : > { %14907 = vmatprep.subr.bf16.mxu1 %v15879_v61 }
 0x5e6   : > { %14244 = vmatmul.mubr.f32.vlgmr.msra.gmra.mrb[20].mxu0 %v16459_v54 }
 0x5e7   : > { %14286 = vmatmul.mubr.f32.vlgmr.msra.gmra.mrb[20].mxu1 %v16465_v56  ;;  %14885 = vmatpush3.bf16.msra.mxu0 %v15879_v61 }
 0x5e8   : > { %14250 = vmatprep.mubr.f32.mxu0 %v16444_v44  ;;  %14909 = vmatpush3.bf16.msra.mxu1 %v15879_v61 }
 0x5e9   : > { %14292 = vmatprep.mubr.f32.mxu1 %v16450_v51  ;;  %14887 = vmatprep.subr.bf16.mxu0 %v15867_v50 }
 0x5ea   : > { %14911 = vmatprep.subr.bf16.mxu1 %v15867_v50 }
 0x5ee   : > { %14251 = vmatmul.mubr.f32.vlgmr.msra.gmra.mrb[20].mxu0 %v16438_v36 }
 0x5ef   : > { %14293 = vmatmul.mubr.f32.vlgmr.msra.gmra.mrb[20].mxu1 %v16442_v43  ;;  %14889 = vmatpush3.bf16.msra.mxu0 %v15867_v50 }
 0x5f0   : > { %14257 = vmatprep.mubr.f32.mxu0 %v16444_v44  ;;  %14913 = vmatpush3.bf16.msra.mxu1 %v15867_v50 }
 0x5f1   : > { %14299 = vmatprep.mubr.f32.mxu1 %v16450_v51  ;;  %14915 = vmatprep.subr.bf16.mxu0 %v15964_v42 }
 0x5f2   : > { %14939 = vmatprep.subr.bf16.mxu1 %v15964_v42 }
 0x5f6   : > { %14258 = vmatmul.mubr.f32.vlgmr.msra.gmra.mrb[20].mxu0 %v16438_v36 }
 0x5f7   : > { %14300 = vmatmul.mubr.f32.vlgmr.msra.gmra.mrb[20].mxu1 %v16442_v43  ;;  %14917 = vmatpush3.bf16.msra.mxu0 %v15964_v42 }
 0x5f8   : > { %14306 = vmatprep.mubr.f32.mxu0 %v10598_v4  ;;  %14941 = vmatpush3.bf16.msra.mxu1 %v15964_v42 }
 0x5f9   : > { %14348 = vmatprep.mubr.f32.mxu1 %v11106_v8  ;;  %14919 = vmatprep.subr.bf16.mxu0 %v15974_v47 }
 0x5fa   : > { %14307 = vmatmul.mubr.f32.vlgmr.msra.gmra.mrb[22].mxu0 %v10608_v38  ;;  %14943 = vmatprep.subr.bf16.mxu1 %v15974_v47 }
 0x5fb   : > { %14349 = vmatmul.mubr.f32.vlgmr.msra.gmra.mrb[22].mxu1 %v11116_v39  ;;  %14921 = vmatpush3.bf16.msra.mxu0 %v15974_v47 }
 0x5fc   : > { %14313 = vmatprep.mubr.f32.mxu0 %v16444_v44  ;;  %14945 = vmatpush3.bf16.msra.mxu1 %v15974_v47 }
 0x5fd   : > { %14355 = vmatprep.mubr.f32.mxu1 %v16450_v51  ;;  %14923 = vmatprep.subr.bf16.mxu0 %v15982_v48 }
 0x5fe   : > { %14947 = vmatprep.subr.bf16.mxu1 %v15982_v48 }
 0x602   : > { %14314 = vmatmul.mubr.f32.vlgmr.msra.gmra.mrb[22].mxu0 %v16438_v36 }
 0x603   : > { %14356 = vmatmul.mubr.f32.vlgmr.msra.gmra.mrb[22].mxu1 %v16442_v43  ;;  %14925 = vmatpush3.bf16.msra.mxu0 %v15982_v48 }
 0x604   : > { %14320 = vmatprep.mubr.f32.mxu0 %v16456_v53  ;;  %14949 = vmatpush3.bf16.msra.mxu1 %v15982_v48 }
 0x605   : > { %14362 = vmatprep.mubr.f32.mxu1 %v16462_v55  ;;  %14927 = vmatprep.subr.bf16.mxu0 %v15964_v42 }
 0x606   : > { %14951 = vmatprep.subr.bf16.mxu1 %v15964_v42 }
 0x60a   : > { %14321 = vmatmul.mubr.f32.vlgmr.msra.gmra.mrb[22].mxu0 %v16448_v46 }
 0x60b   : > { %14363 = vmatmul.mubr.f32.vlgmr.msra.gmra.mrb[22].mxu1 %v16453_v52  ;;  %14929 = vmatpush3.bf16.msra.mxu0 %v15964_v42 }
 0x60c   : > { %14327 = vmatprep.mubr.f32.mxu0 %v16468_v57  ;;  %14953 = vmatpush3.bf16.msra.mxu1 %v15964_v42 }
 0x60d   : > { %14369 = vmatprep.mubr.f32.mxu1 %v16471_v58  ;;  %14931 = vmatprep.subr.bf16.mxu0 %v16001_v49 }
 0x60e   : > { %14955 = vmatprep.subr.bf16.mxu1 %v16001_v49 }
 0x612   : > { %14328 = vmatmul.mubr.f32.vlgmr.msra.gmra.mrb[22].mxu0 %v16459_v54 }
 0x613   : > { %14370 = vmatmul.mubr.f32.vlgmr.msra.gmra.mrb[22].mxu1 %v16465_v56  ;;  %14933 = vmatpush3.bf16.msra.mxu0 %v16001_v49 }
 0x614   : > { %14334 = vmatprep.mubr.f32.mxu0 %v16444_v44  ;;  %14957 = vmatpush3.bf16.msra.mxu1 %v16001_v49 }
 0x615   : > { %14376 = vmatprep.mubr.f32.mxu1 %v16450_v51  ;;  %14935 = vmatprep.subr.bf16.mxu0 %v15964_v42 }
 0x616   : > { %14959 = vmatprep.subr.bf16.mxu1 %v15964_v42 }
 0x61a   : > { %14335 = vmatmul.mubr.f32.vlgmr.msra.gmra.mrb[22].mxu0 %v16438_v36 }
 0x61b   : > { %14377 = vmatmul.mubr.f32.vlgmr.msra.gmra.mrb[22].mxu1 %v16442_v43  ;;  %14937 = vmatpush3.bf16.msra.mxu0 %v15964_v42 }
 0x61c   : > { %14341 = vmatprep.mubr.f32.mxu0 %v16444_v44  ;;  %14961 = vmatpush3.bf16.msra.mxu1 %v15964_v42 }
 0x61d   : > { %14383 = vmatprep.mubr.f32.mxu1 %v16450_v51 }
 0x622   : > { %14342 = vmatmul.mubr.f32.vlgmr.msra.gmra.mrb[22].mxu0 %v16438_v36 }
 0x623   : > { %14384 = vmatmul.mubr.f32.vlgmr.msra.gmra.mrb[22].mxu1 %v16442_v43 }
 0x6c9   : > { %v14259_v50 = vpop.f32.mrb[20].mxu0 }
 0x6ca   : > { %v11538_v59 = vmul.f32 %v14259_v50, %v14259_v50  ;;  %v14301_v60 = vpop.f32.mrb[20].mxu1  ;;  %v11019_v61 = vpop.f32.mrb[21].mxu0 }
 0x6cb   : > { %v11540_v47 = vmul.f32 %v14301_v60, %v14301_v60  ;;  %v11537_v48 = vmul.f32 %v11019_v61, %v11019_v61  ;;  %v11527_v49 = vpop.f32.mrb[21].mxu1 }
 0x6cc   : > { %v11539_v20 = vmul.f32 %v11527_v49, %v11527_v49 }
 0x6cd   : > { %v11542_v21 = vadd.f32 %v11540_v47, %v11538_v59 }
 0x6ce   : > { %v11541_v26 = vadd.f32 %v11539_v20, %v11537_v48 }
 0x6f5   : > { %v14343_v42 = vpop.f32.mrb[22].mxu0 }
 0x6f6   : > { %v12548_v13 = vmul.f32 %v14343_v42, %v14343_v42  ;;  %v14385_v27 = vpop.f32.mrb[22].mxu1  ;;  %v12035_v62 = vpop.f32.mrb[23].mxu0 }
 0x6f7   : > { %v12550_v3 = vmul.f32 %v14385_v27, %v14385_v27  ;;  %v12547_v11 = vmul.f32 %v12035_v62, %v12035_v62  ;;  %v12537_v12 = vpop.f32.mrb[23].mxu1 }
 0x6f8   : > { %v12549_v15 = vmul.f32 %v12537_v12, %v12537_v12 }
 0x6f9   : > { %v12552_v18 = vadd.f32 %v12550_v3, %v12548_v13 }
 0x6fa   : > { %v12551_v14 = vadd.f32 %v12549_v15, %v12547_v11 }
 0x6fc   : > { %vm12553_vm11 = vcmp.gt.f32.partialorder %v12551_v14, %v11541_v26 }
 0x6fd   : > { %v12554_v17 = vsel %vm12553_vm11, %v12035_v62, %v11019_v61  ;;  %v12555_v19 = vsel %vm12553_vm11, %v12537_v12, %v11527_v49  ;;  %v12556_v9 = vsel %vm12553_vm11, %v12551_v14, %v11541_v26 }
 0x6fe   : > { %vm12557_vm12 = vcmp.gt.f32.partialorder %v11542_v21, %v12556_v9 }
 0x6ff   : > { %v12558_v16 = vsel %vm12557_vm12, %v14259_v50, %v12554_v17  ;;  %v12559_v22 = vsel %vm12557_vm12, %v14301_v60, %v12555_v19  ;;  %v12560_v23 = vsel %vm12557_vm12, %v11542_v21, %v12556_v9 }
 0x700   : > { %vm12561_vm13 = vcmp.gt.f32.partialorder %v12552_v18, %v12560_v23 }
 0x701   : > { %v12562_v24 = vsel %vm12561_vm13, %v14343_v42, %v12558_v16  ;;  %v12563_v25 = vsel %vm12561_vm13, %v14385_v27, %v12559_v22 }
 0x702   : > { %12786 = vst.msk [vmem:[%s16075_s9 + $0x18] sm:$0xff] %vm3394_vm3, %v12562_v24  ;;  %12787 = vst.msk [vmem:[%s16079_s8 + $0x18] sm:$0xff] %vm3394_vm3, %v12563_v25 }
 0x703   : > { %15412 = shalt.err (!%p15409_p7)
}
 0x704   : > { %s15413_s17 = scalar_lea.hbm %s16571_s10, 512  ;;  %s15417_s8 = scalar_lea.hbm %s16660_s4, 1024 }
 0x705   : > { %p15414_p9 = scmp.ne.s32.totalorder %s16571_s10, %s15413_s17  ;;  %p15418_p11 = scmp.lt.u32.totalorder %s16571_s10, %s16660_s4 }
 0x706   : > { %p15419_p2 = scmp.lt.u32.totalorder %s15417_s8, %s15413_s17  ;;  %p15421_p1 = scmp.lt.u32.totalorder %s15413_s17, %s16571_s10 }
 0x707   : > { %p15415_p0 = pnand %p15414_p9, %p16687_p13 }
 0x708   : > { %p15420_p12 = por %p15419_p2, %p15418_p11 }
 0x709   : > { %p15416_p8 = pneg %p15415_p0 }
 0x70a   : > { %p15422_p6 = por %p15421_p1, %p15420_p12 }
 0x70c   : > { %p15423_p10 = pnand %p15422_p6, %p15416_p8 }
 0x70e   : > { %15426 = shalt.err (!%p15423_p10)
}
 0x70f   : > { %s15518_s15 = smov 128   ;;  %s15519_s22 = smov 8  }
 0x710   : > { %15214 = dma.vmem_to_hbm [thread:$0]  (%p16687_p13), %s16573_s16, 512, %s16571_s10, %s12569_s6, %s15518_s15, %s15518_s15, %s15519_s22  }
 0x711   : > { %s12574_s28 = scalar_lea.sflag [#allocation12], %s15772_s13  ;;  %s15427_s30 = scalar_lea.vmem %s16566_s11, 512 }
 0x712   : > { %p15428_p4 = scmp.ne.s32.totalorder %s16566_s11, %s15427_s30  ;;  %s15520_s2 = smov [#allocation11]  }
 0x713   : > { %s15431_s12 = sshll.u32 %s15520_s2, 4  ;;  %s15432_s12 = int_to_ptr.vmem [resolvable:$false] %s15431_s12 }
 0x714   : > { %p15429_p5 = pnand %p15428_p4, %p16687_p13  ;;  %s15433_s26 = scalar_lea.vmem %s15432_s12, 1024 }
 0x715   : > { %p15434_p7 = scmp.lt.s32.totalorder %s16566_s11, %s15432_s12  ;;  %p15435_p9 = scmp.lt.s32.totalorder %s15433_s26, %s15427_s30 }
 0x716   : > { %p15430_p3 = pneg %p15429_p5 }
 0x717   : > { %p15436_p0 = por %p15435_p9, %p15434_p7 }
 0x719   : > { %p15437_p8 = pnand %p15436_p0, %p15430_p3 }
 0x71b   : > { %15440 = shalt.err (!%p15437_p8)
}
 0x71c   : > { %s15441_s16 = scalar_lea.hbm %s16578_s0, 512  ;;  %s15445_s17 = scalar_lea.hbm %s16661_s5, 1024 }
 0x71d   : > { %p15442_p11 = scmp.ne.s32.totalorder %s16578_s0, %s15441_s16  ;;  %p15446_p1 = scmp.lt.u32.totalorder %s16578_s0, %s16661_s5 }
 0x71e   : > { %p15447_p6 = scmp.lt.u32.totalorder %s15445_s17, %s15441_s16  ;;  %p15449_p4 = scmp.lt.u32.totalorder %s15441_s16, %s16578_s0 }
 0x71f   : > { %p15443_p2 = pnand %p15442_p11, %p16687_p13 }
 0x720   : > { %p15448_p10 = por %p15447_p6, %p15446_p1 }
 0x721   : > { %p15444_p12 = pneg %p15443_p2 }
 0x722   : > { %p15450_p5 = por %p15449_p4, %p15448_p10 }
 0x724   : > { %p15451_p3 = pnand %p15450_p5, %p15444_p12 }
 0x726   : > { %15454 = shalt.err (!%p15451_p3)
}
 0x727   : > { %15215 = dma.vmem_to_hbm [thread:$0]  (%p16687_p13), %s16566_s11, 512, %s16578_s0, %s12574_s28, %s15518_s15, %s15518_s15, %s15519_s22  }
 0x728 PF: > { %s12618_s8 = sand.u32 1, %s15497_s18   ;;  %p16688_p7 = scmp.ne.s32.totalorder %s16672_s25, 0 }
 0x729   : > { %p16689_p9 = scmp.ge.s32.totalorder %s15509_s21, 2  ;;  %s12619_s14 = scalar_lea.sflag [#allocation4], %s12618_s8 }
 0x72b   : > { %p15233_p0 = pnand %p16689_p9, %p16688_p7 }
 0x72d   : > { %15488 = dma.done.wait (!%p15233_p0), %s12619_s14, 512  }
 0x72e   : > { %15490 = vsyncadd (!%p15233_p0), %s12619_s14, 4294966784  ;;  %s12628_s23 = scalar_lea.sflag [#allocation12], %s12618_s8 }
 0x72f   : > { %15492 = dma.done.wait (!%p15233_p0), %s12628_s23, 512  }
 0x730   : > { %15494 = vsyncadd (!%p15233_p0), %s12628_s23, 4294966784  ;;  %p26_p13 = scmp.ge.s32.totalorder %s15667_s29, 4   ;;  %s16690_s18 = smov %s15501_s19 }
 0x731   : > { %s16691_s19 = smov %s15505_s20  ;;  %s16692_s20 = smov %s15683_s27 }
 0x732   : > { %s16693_s21 = smov %s15667_s29  ;;  %28 = sbr.rel (!%p26_p13) target bundleno = 13 (0xd), region = 132 }
 0x739   :  { %12633 = vsyncpa [#allocation3], 1 }
 0x73a   :  { %12635 = vsyncpa [#allocation3 + $0x1], 1 }
 0x73b   :  { %12636 = vsyncpa [#allocation6], 1 }
 0x73c   :  { %12638 = vsyncpa [#allocation6 + $0x1], 1 }
 0x73d   :  { %12639 = vsyncpa [#allocation9], 1 }
 0x73e   :  { %12640 = vsyncpa [#allocation4], 1 }
 0x73f   :  { %12642 = vsyncpa [#allocation4 + $0x1], 1 }
 0x740   :  { %12643 = vsyncpa [#allocation12], 1 }
 0x741   :  { %12645 = vsyncpa [#allocation12 + $0x1], 1 }

</bundles_post_ra>
